<compile_context>
chip_gen: v7x
topology: tpu7x:2x2x1
jax: 0.10.0
libtpu: 0.0.40
codegen_flags: <defaults>
</compile_context>

<pallas_src>
import jax
import jax.numpy as jnp
from jax.experimental import pallas as pl
from jax.experimental.pallas import tpu as pltpu


def _mlp_kernel(u_ref, g_ref, a_ref, occ_ref, mv_ref, gr_ref,
                w1_ref, b1_ref, w2_ref, b2_ref, w3_ref, b3_ref, out_ref):
    f32 = jnp.float32
    # fc1: split-K sum of six [TB, E] x [E, H] bf16 matmuls, f32 accumulation.
    h1 = jnp.dot(u_ref[...], w1_ref[0], preferred_element_type=f32)
    h1 = h1 + jnp.dot(g_ref[...], w1_ref[1], preferred_element_type=f32)
    h1 = h1 + jnp.dot(a_ref[...], w1_ref[2], preferred_element_type=f32)
    h1 = h1 + jnp.dot(occ_ref[...], w1_ref[3], preferred_element_type=f32)
    h1 = h1 + jnp.dot(mv_ref[...], w1_ref[4], preferred_element_type=f32)
    h1 = h1 + jnp.dot(gr_ref[...], w1_ref[5], preferred_element_type=f32)
    h1 = jnp.maximum(h1 + b1_ref[...], 0.0)               # [TB, H] f32

    # dropout(p=0.2) == identity in eval mode.
    # fc2 + ReLU (bf16 MXU inputs, f32 accumulate, f32 bias/ReLU).
    h2 = jnp.dot(h1.astype(jnp.bfloat16), w2_ref[...],
                 preferred_element_type=f32)
    h2 = jnp.maximum(h2 + b2_ref[...], 0.0)               # [TB, H] f32

    # fc3 (N=1): VPU multiply + lane reduction (keeps MXU free), written
    # lane-dense into the (1, TB) output block.
    red = jnp.sum(h2 * w3_ref[...], axis=-1)              # [TB] f32
    out_ref[...] = (red + b3_ref[0])[None, :].astype(out_ref.dtype)


def mlp_pallas(embs, w1s, b1, w2, b2, w3row, b3, *, block_b=None):
    """embs: six [B, E] bf16 slabs -> [B] f32 via fc1/relu/fc2/relu/fc3."""
    B, E = embs[0].shape
    H = w2.shape[0]

    if block_b is None:
        # Multiple of 256 (MXU M on v6e/v7x; also a multiple of v5e's 128),
        # capped at 1024 to stay well inside v7x's 64 MiB VMEM when
        # double-buffered.
        block_b = min(1024, 256 * ((B + 255) // 256))

    n_blocks = pl.cdiv(B, block_b)
    b_pad = n_blocks * block_b
    if b_pad != B:
        embs = [jnp.pad(e, ((0, b_pad - B), (0, 0))) for e in embs]

    act_spec = pl.BlockSpec((block_b, E), lambda i: (i, 0))

    def pinned(shape):
        # Weight/bias stays VMEM-resident: same block for every grid step.
        return pl.BlockSpec(shape, lambda i: (0,) * len(shape))

    out = pl.pallas_call(
        _mlp_kernel,
        out_shape=jax.ShapeDtypeStruct((1, b_pad), jnp.float32),
        grid=(n_blocks,),
        in_specs=[act_spec] * 6 + [
            pinned((6, E, H)),                                   # w1 slabs (bf16)
            pinned((1, H)),                                      # b1 (f32)
            pinned((H, H)),                                      # w2 (bf16)
            pinned((1, H)),                                      # b2 (f32)
            pinned((1, H)),                                      # w3 row (f32)
            pl.BlockSpec(memory_space=pltpu.MemorySpace.SMEM),   # b3 scalar
        ],
        out_specs=pl.BlockSpec((1, block_b), lambda i: (0, i)),
        compiler_params=pltpu.CompilerParams(
            dimension_semantics=("parallel",),
            vmem_limit_bytes=32 * 1024 * 1024,
        ),
    )(*embs, w1s, b1, w2, b2, w3row, b3)

    return out.reshape(-1)[:B]


def movie_recommender_forward(params, user_ids, gender_ids, age_ids,
                              occupation_ids, movie_ids, genre_ids):
    bf16 = jnp.bfloat16
    # Embedding lookups (gathers) — plain JAX glue; cast to bf16 for the MXU
    # and to halve the HBM DMA bytes into the kernel.
    embs = [
        params["user_emb"][user_ids].astype(bf16),
        params["gender_emb"][gender_ids].astype(bf16),
        params["age_emb"][age_ids].astype(bf16),
        params["occupation_emb"][occupation_ids].astype(bf16),
        params["movie_emb"][movie_ids].astype(bf16),
        params["genre_emb"][genre_ids].astype(bf16),
    ]
    E = params["user_emb"].shape[1]
    H = params["w2"].shape[0]

    w1s = params["w1"].reshape(6, E, H).astype(bf16)   # split-K slabs
    w2 = params["w2"].astype(bf16)
    w3row = params["w3"].T                             # (1, H) f32
    b3 = params["b3"].reshape(1)                       # scalar via SMEM

    return mlp_pallas(embs, w1s, params["b1"], w2, params["b2"], w3row, b3)


def init_params(key, num_users, num_genders, num_ages, num_occupations,
                num_movies, num_genres, embedding_dim, hidden_dim):
    keys = jax.random.split(key, 12)
    E, H = embedding_dim, hidden_dim
    F = 6 * E

    def emb(k, n):
        # nn.Embedding default init: N(0, 1)
        return jax.random.normal(k, (n, E), dtype=jnp.float32)

    def linear(kw, kb, fan_in, fan_out):
        # nn.Linear default init: U(-1/sqrt(fan_in), 1/sqrt(fan_in))
        bound = 1.0 / jnp.sqrt(fan_in)
        w = jax.random.uniform(kw, (fan_in, fan_out), jnp.float32, -bound, bound)
        b = jax.random.uniform(kb, (1, fan_out), jnp.float32, -bound, bound)
        return w, b

    w1, b1 = linear(keys[6], keys[7], F, H)
    w2, b2 = linear(keys[8], keys[9], H, H)
    w3, b3 = linear(keys[10], keys[11], H, 1)

    return {
        "user_emb": emb(keys[0], num_users),
        "gender_emb": emb(keys[1], num_genders),
        "age_emb": emb(keys[2], num_ages),
        "occupation_emb": emb(keys[3], num_occupations),
        "movie_emb": emb(keys[4], num_movies),
        "genre_emb": emb(keys[5], num_genres),
        "w1": w1, "b1": b1,
        "w2": w2, "b2": b2,
        "w3": w3, "b3": b3,
    }


if __name__ == "__main__":
    # Small, module-consistent shapes.
    num_users, num_genders, num_ages = 100, 2, 7
    num_occupations, num_movies, num_genres = 21, 200, 18
    embedding_dim, hidden_dim = 32, 128
    B = 8

    key = jax.random.PRNGKey(0)
    pkey, ikey = jax.random.split(key)
    params = init_params(pkey, num_users, num_genders, num_ages,
                         num_occupations, num_movies, num_genres,
                         embedding_dim, hidden_dim)

    ik = jax.random.split(ikey, 6)
    user_ids = jax.random.randint(ik[0], (B,), 0, num_users, dtype=jnp.int32)
    gender_ids = jax.random.randint(ik[1], (B,), 0, num_genders, dtype=jnp.int32)
    age_ids = jax.random.randint(ik[2], (B,), 0, num_ages, dtype=jnp.int32)
    occupation_ids = jax.random.randint(ik[3], (B,), 0, num_occupations, dtype=jnp.int32)
    movie_ids = jax.random.randint(ik[4], (B,), 0, num_movies, dtype=jnp.int32)
    genre_ids = jax.random.randint(ik[5], (B,), 0, num_genres, dtype=jnp.int32)

    out = movie_recommender_forward(params, user_ids, gender_ids, age_ids,
                                    occupation_ids, movie_ids, genre_ids)
    out = jax.block_until_ready(out)

    # Pure-JAX reference with the same bf16-input / f32-accumulation numerics
    # as the kernel (the PyTorch spec is float64, which TPU cannot match).
    def ref(params, u, g, a, o, m, gr):
        bf16 = jnp.bfloat16
        x = jnp.concatenate(
            [params["user_emb"][u], params["gender_emb"][g],
             params["age_emb"][a], params["occupation_emb"][o],
             params["movie_emb"][m], params["genre_emb"][gr]],
            axis=-1).astype(bf16)
        h1 = jnp.maximum(
            jnp.dot(x, params["w1"].astype(bf16),
                    preferred_element_type=jnp.float32) + params["b1"], 0.0)
        h2 = jnp.maximum(
            jnp.dot(h1.astype(bf16), params["w2"].astype(bf16),
                    preferred_element_type=jnp.float32) + params["b2"], 0.0)
        return (jnp.dot(h2, params["w3"], preferred_element_type=jnp.float32)
                + params["b3"]).reshape(-1)

    expected = ref(params, user_ids, gender_ids, age_ids,
                   occupation_ids, movie_ids, genre_ids)
    assert out.shape == (B,)
    assert jnp.allclose(out, expected, atol=5e-3, rtol=5e-3), (
        jnp.max(jnp.abs(out - expected)))
    print("KERNEL_OK")
</pallas_src>

<mosaic_0001>
module attributes {stable_mosaic.version = 11 : i64} {
  func.func @_mlp_kernel(%arg0: i32, %arg1: memref<256x32xbf16, #tpu.memory_space<vmem>>, %arg2: memref<256x32xbf16, #tpu.memory_space<vmem>>, %arg3: memref<256x32xbf16, #tpu.memory_space<vmem>>, %arg4: memref<256x32xbf16, #tpu.memory_space<vmem>>, %arg5: memref<256x32xbf16, #tpu.memory_space<vmem>>, %arg6: memref<256x32xbf16, #tpu.memory_space<vmem>>, %arg7: memref<6x32x128xbf16, #tpu.memory_space<vmem>>, %arg8: memref<1x128xf32, #tpu.memory_space<vmem>>, %arg9: memref<128x128xbf16, #tpu.memory_space<vmem>>, %arg10: memref<1x128xf32, #tpu.memory_space<vmem>>, %arg11: memref<1x128xf32, #tpu.memory_space<vmem>>, %arg12: memref<1xf32, #tpu.memory_space<smem>>, %arg13: memref<1x256xf32, #tpu.memory_space<vmem>>) attributes {dimension_semantics = [#tpu.dimension_semantics<parallel>], iteration_bounds = array<i64: 1>, scalar_prefetch = 0 : i64, scratch_operands = 0 : i64, tpu.core_type = #tpu.core_type<tc>, window_params = [{transform_indices = @transform_0, window_bounds = array<i64: 256, 32>}, {transform_indices = @transform_1, window_bounds = array<i64: 256, 32>}, {transform_indices = @transform_2, window_bounds = array<i64: 256, 32>}, {transform_indices = @transform_3, window_bounds = array<i64: 256, 32>}, {transform_indices = @transform_4, window_bounds = array<i64: 256, 32>}, {transform_indices = @transform_5, window_bounds = array<i64: 256, 32>}, {pipeline_mode = #tpu.pipeline_mode<synchronous>, transform_indices = @transform_6, window_bounds = array<i64: 6, 32, 128>}, {pipeline_mode = #tpu.pipeline_mode<synchronous>, transform_indices = @transform_7, window_bounds = array<i64: 1, 128>}, {pipeline_mode = #tpu.pipeline_mode<synchronous>, transform_indices = @transform_8, window_bounds = array<i64: 128, 128>}, {pipeline_mode = #tpu.pipeline_mode<synchronous>, transform_indices = @transform_9, window_bounds = array<i64: 1, 128>}, {pipeline_mode = #tpu.pipeline_mode<synchronous>, transform_indices = @transform_10, window_bounds = array<i64: 1, 128>}, {transform_indices = @transform_11, window_bounds = array<i64: 1>}, {transform_indices = @transform_12, window_bounds = array<i64: 1, 256>}]} {
    %c0 = arith.constant 0 : index
    %c0_0 = arith.constant 0 : index
    %0 = vector.load %arg1[%c0, %c0_0] : memref<256x32xbf16, #tpu.memory_space<vmem>>, vector<256x32xbf16>
    %c0_1 = arith.constant 0 : index
    %c0_2 = arith.constant 0 : index
    %c0_3 = arith.constant 0 : index
    %1 = vector.load %arg7[%c0_1, %c0_2, %c0_3] : memref<6x32x128xbf16, #tpu.memory_space<vmem>>, vector<1x32x128xbf16>
    %2 = vector.shape_cast %1 : vector<1x32x128xbf16> to vector<32x128xbf16>
    %cst = arith.constant dense<0.000000e+00> : vector<256x128xf32>
    %3 = tpu.matmul %0, %2, %cst {dimension_numbers = #tpu.dot_dimension_numbers<[1], [0], [0], [1], [0, 0, 1, 1], [], []>} : vector<256x32xbf16>, vector<32x128xbf16>, vector<256x128xf32> -> vector<256x128xf32>
    %c0_4 = arith.constant 0 : index
    %c0_5 = arith.constant 0 : index
    %4 = vector.load %arg2[%c0_4, %c0_5] : memref<256x32xbf16, #tpu.memory_space<vmem>>, vector<256x32xbf16>
    %c1 = arith.constant 1 : index
    %c0_6 = arith.constant 0 : index
    %c0_7 = arith.constant 0 : index
    %5 = vector.load %arg7[%c1, %c0_6, %c0_7] : memref<6x32x128xbf16, #tpu.memory_space<vmem>>, vector<1x32x128xbf16>
    %6 = vector.shape_cast %5 : vector<1x32x128xbf16> to vector<32x128xbf16>
    %cst_8 = arith.constant dense<0.000000e+00> : vector<256x128xf32>
    %7 = tpu.matmul %4, %6, %cst_8 {dimension_numbers = #tpu.dot_dimension_numbers<[1], [0], [0], [1], [0, 0, 1, 1], [], []>} : vector<256x32xbf16>, vector<32x128xbf16>, vector<256x128xf32> -> vector<256x128xf32>
    %8 = arith.addf %3, %7 : vector<256x128xf32>
    %c0_9 = arith.constant 0 : index
    %c0_10 = arith.constant 0 : index
    %9 = vector.load %arg3[%c0_9, %c0_10] : memref<256x32xbf16, #tpu.memory_space<vmem>>, vector<256x32xbf16>
    %c2 = arith.constant 2 : index
    %c0_11 = arith.constant 0 : index
    %c0_12 = arith.constant 0 : index
    %10 = vector.load %arg7[%c2, %c0_11, %c0_12] : memref<6x32x128xbf16, #tpu.memory_space<vmem>>, vector<1x32x128xbf16>
    %11 = vector.shape_cast %10 : vector<1x32x128xbf16> to vector<32x128xbf16>
    %cst_13 = arith.constant dense<0.000000e+00> : vector<256x128xf32>
    %12 = tpu.matmul %9, %11, %cst_13 {dimension_numbers = #tpu.dot_dimension_numbers<[1], [0], [0], [1], [0, 0, 1, 1], [], []>} : vector<256x32xbf16>, vector<32x128xbf16>, vector<256x128xf32> -> vector<256x128xf32>
    %13 = arith.addf %8, %12 : vector<256x128xf32>
    %c0_14 = arith.constant 0 : index
    %c0_15 = arith.constant 0 : index
    %14 = vector.load %arg4[%c0_14, %c0_15] : memref<256x32xbf16, #tpu.memory_space<vmem>>, vector<256x32xbf16>
    %c3 = arith.constant 3 : index
    %c0_16 = arith.constant 0 : index
    %c0_17 = arith.constant 0 : index
    %15 = vector.load %arg7[%c3, %c0_16, %c0_17] : memref<6x32x128xbf16, #tpu.memory_space<vmem>>, vector<1x32x128xbf16>
    %16 = vector.shape_cast %15 : vector<1x32x128xbf16> to vector<32x128xbf16>
    %cst_18 = arith.constant dense<0.000000e+00> : vector<256x128xf32>
    %17 = tpu.matmul %14, %16, %cst_18 {dimension_numbers = #tpu.dot_dimension_numbers<[1], [0], [0], [1], [0, 0, 1, 1], [], []>} : vector<256x32xbf16>, vector<32x128xbf16>, vector<256x128xf32> -> vector<256x128xf32>
    %18 = arith.addf %13, %17 : vector<256x128xf32>
    %c0_19 = arith.constant 0 : index
    %c0_20 = arith.constant 0 : index
    %19 = vector.load %arg5[%c0_19, %c0_20] : memref<256x32xbf16, #tpu.memory_space<vmem>>, vector<256x32xbf16>
    %c4 = arith.constant 4 : index
    %c0_21 = arith.constant 0 : index
    %c0_22 = arith.constant 0 : index
    %20 = vector.load %arg7[%c4, %c0_21, %c0_22] : memref<6x32x128xbf16, #tpu.memory_space<vmem>>, vector<1x32x128xbf16>
    %21 = vector.shape_cast %20 : vector<1x32x128xbf16> to vector<32x128xbf16>
    %cst_23 = arith.constant dense<0.000000e+00> : vector<256x128xf32>
    %22 = tpu.matmul %19, %21, %cst_23 {dimension_numbers = #tpu.dot_dimension_numbers<[1], [0], [0], [1], [0, 0, 1, 1], [], []>} : vector<256x32xbf16>, vector<32x128xbf16>, vector<256x128xf32> -> vector<256x128xf32>
    %23 = arith.addf %18, %22 : vector<256x128xf32>
    %c0_24 = arith.constant 0 : index
    %c0_25 = arith.constant 0 : index
    %24 = vector.load %arg6[%c0_24, %c0_25] : memref<256x32xbf16, #tpu.memory_space<vmem>>, vector<256x32xbf16>
    %c5 = arith.constant 5 : index
    %c0_26 = arith.constant 0 : index
    %c0_27 = arith.constant 0 : index
    %25 = vector.load %arg7[%c5, %c0_26, %c0_27] : memref<6x32x128xbf16, #tpu.memory_space<vmem>>, vector<1x32x128xbf16>
    %26 = vector.shape_cast %25 : vector<1x32x128xbf16> to vector<32x128xbf16>
    %cst_28 = arith.constant dense<0.000000e+00> : vector<256x128xf32>
    %27 = tpu.matmul %24, %26, %cst_28 {dimension_numbers = #tpu.dot_dimension_numbers<[1], [0], [0], [1], [0, 0, 1, 1], [], []>} : vector<256x32xbf16>, vector<32x128xbf16>, vector<256x128xf32> -> vector<256x128xf32>
    %28 = arith.addf %23, %27 : vector<256x128xf32>
    %c0_29 = arith.constant 0 : index
    %c0_30 = arith.constant 0 : index
    %29 = vector.load %arg8[%c0_29, %c0_30] : memref<1x128xf32, #tpu.memory_space<vmem>>, vector<1x128xf32>
    %30 = vector.broadcast %29 : vector<1x128xf32> to vector<256x128xf32>
    %31 = arith.addf %28, %30 : vector<256x128xf32>
    %cst_31 = arith.constant 0.000000e+00 : f32
    %32 = vector.broadcast %cst_31 : f32 to vector<256x128xf32>
    %33 = arith.maximumf %31, %32 : vector<256x128xf32>
    %34 = arith.truncf %33 : vector<256x128xf32> to vector<256x128xbf16>
    %c0_32 = arith.constant 0 : index
    %c0_33 = arith.constant 0 : index
    %35 = vector.load %arg9[%c0_32, %c0_33] : memref<128x128xbf16, #tpu.memory_space<vmem>>, vector<128x128xbf16>
    %cst_34 = arith.constant dense<0.000000e+00> : vector<256x128xf32>
    %36 = tpu.matmul %34, %35, %cst_34 {dimension_numbers = #tpu.dot_dimension_numbers<[1], [0], [0], [1], [0, 0, 1, 1], [], []>} : vector<256x128xbf16>, vector<128x128xbf16>, vector<256x128xf32> -> vector<256x128xf32>
    %c0_35 = arith.constant 0 : index
    %c0_36 = arith.constant 0 : index
    %37 = vector.load %arg10[%c0_35, %c0_36] : memref<1x128xf32, #tpu.memory_space<vmem>>, vector<1x128xf32>
    %38 = vector.broadcast %37 : vector<1x128xf32> to vector<256x128xf32>
    %39 = arith.addf %36, %38 : vector<256x128xf32>
    %cst_37 = arith.constant 0.000000e+00 : f32
    %40 = vector.broadcast %cst_37 : f32 to vector<256x128xf32>
    %41 = arith.maximumf %39, %40 : vector<256x128xf32>
    %c0_38 = arith.constant 0 : index
    %c0_39 = arith.constant 0 : index
    %42 = vector.load %arg11[%c0_38, %c0_39] : memref<1x128xf32, #tpu.memory_space<vmem>>, vector<1x128xf32>
    %43 = vector.broadcast %42 : vector<1x128xf32> to vector<256x128xf32>
    %44 = arith.mulf %41, %43 : vector<256x128xf32>
    %cst_40 = arith.constant dense<0.000000e+00> : vector<256xf32>
    %45 = vector.multi_reduction <add>, %44, %cst_40 [1] : vector<256x128xf32> to vector<256xf32>
    %c0_41 = arith.constant 0 : index
    %46 = memref.load %arg12[%c0_41] : memref<1xf32, #tpu.memory_space<smem>>
    %47 = vector.broadcast %46 : f32 to vector<256xf32>
    %48 = arith.addf %45, %47 : vector<256xf32>
    %49 = vector.shape_cast %48 : vector<256xf32> to vector<1x256xf32>
    %c0_42 = arith.constant 0 : index
    %c0_43 = arith.constant 0 : index
    %50 = vector.load %arg13[%c0_42, %c0_43] : memref<1x256xf32, #tpu.memory_space<vmem>>, vector<1x256xf32>
    tpu.vector_store %arg13[%c0_42, %c0_43], %49 {strides = array<i32>} : memref<1x256xf32, #tpu.memory_space<vmem>>, vector<1x256xf32>,
    return
  }
  func.func @transform_0(%arg0: i32) -> (i32, i32) {
    %c0_i32 = arith.constant 0 : i32
    %c0_i32_0 = arith.constant 0 : i32
    return %arg0, %c0_i32 : i32, i32
  }
  func.func @transform_1(%arg0: i32) -> (i32, i32) {
    %c0_i32 = arith.constant 0 : i32
    %c0_i32_0 = arith.constant 0 : i32
    return %arg0, %c0_i32 : i32, i32
  }
  func.func @transform_2(%arg0: i32) -> (i32, i32) {
    %c0_i32 = arith.constant 0 : i32
    %c0_i32_0 = arith.constant 0 : i32
    return %arg0, %c0_i32 : i32, i32
  }
  func.func @transform_3(%arg0: i32) -> (i32, i32) {
    %c0_i32 = arith.constant 0 : i32
    %c0_i32_0 = arith.constant 0 : i32
    return %arg0, %c0_i32 : i32, i32
  }
  func.func @transform_4(%arg0: i32) -> (i32, i32) {
    %c0_i32 = arith.constant 0 : i32
    %c0_i32_0 = arith.constant 0 : i32
    return %arg0, %c0_i32 : i32, i32
  }
  func.func @transform_5(%arg0: i32) -> (i32, i32) {
    %c0_i32 = arith.constant 0 : i32
    %c0_i32_0 = arith.constant 0 : i32
    return %arg0, %c0_i32 : i32, i32
  }
  func.func @transform_6(%arg0: i32) -> (i32, i32, i32) {
    %c0_i32 = arith.constant 0 : i32
    %c0_i32_0 = arith.constant 0 : i32
    %c0_i32_1 = arith.constant 0 : i32
    %c0_i32_2 = arith.constant 0 : i32
    return %c0_i32, %c0_i32_0, %c0_i32_1 : i32, i32, i32
  }
  func.func @transform_7(%arg0: i32) -> (i32, i32) {
    %c0_i32 = arith.constant 0 : i32
    %c0_i32_0 = arith.constant 0 : i32
    %c0_i32_1 = arith.constant 0 : i32
    return %c0_i32, %c0_i32_0 : i32, i32
  }
  func.func @transform_8(%arg0: i32) -> (i32, i32) {
    %c0_i32 = arith.constant 0 : i32
    %c0_i32_0 = arith.constant 0 : i32
    %c0_i32_1 = arith.constant 0 : i32
    return %c0_i32, %c0_i32_0 : i32, i32
  }
  func.func @transform_9(%arg0: i32) -> (i32, i32) {
    %c0_i32 = arith.constant 0 : i32
    %c0_i32_0 = arith.constant 0 : i32
    %c0_i32_1 = arith.constant 0 : i32
    return %c0_i32, %c0_i32_0 : i32, i32
  }
  func.func @transform_10(%arg0: i32) -> (i32, i32) {
    %c0_i32 = arith.constant 0 : i32
    %c0_i32_0 = arith.constant 0 : i32
    %c0_i32_1 = arith.constant 0 : i32
    return %c0_i32, %c0_i32_0 : i32, i32
  }
  func.func @transform_11(%arg0: i32) -> i32 {
    %c0_i32 = arith.constant 0 : i32
    %c0_i32_0 = arith.constant 0 : i32
    return %c0_i32 : i32
  }
  func.func @transform_12(%arg0: i32) -> (i32, i32) {
    %c0_i32 = arith.constant 0 : i32
    %c0_i32_0 = arith.constant 0 : i32
    return %c0_i32, %arg0 : i32, i32
  }
}

</mosaic_0001>

<bundles_post_ra>
// kernel: tpu_custom_call.1
= control target key start
LH: loop header
LB: loop body
LE: loop exit
PB: predicated region body
PF: predicated region fallthrough
CT: control target
= control target key end

     0   :  { %vm209_vm0 = vcmask 261120   ;;  %s8199_s0 = inlined_call_operand.vmem [shape: bf16[256,32], index: 0, kind: input, shape index: {}]   ;;  %s8200_s1 = inlined_call_operand.vmem [shape: bf16[256,32], index: 1, kind: input, shape index: {}]   ;;  %s8201_s2 = inlined_call_operand.vmem [shape: bf16[256,32], index: 2, kind: input, shape index: {}]   ;;  %s8202_s3 = inlined_call_operand.vmem [shape: bf16[256,32], index: 3, kind: input, shape index: {}]   ;;  %s8203_s4 = inlined_call_operand.vmem [shape: bf16[256,32], index: 4, kind: input, shape index: {}]   ;;  %s8204_s5 = inlined_call_operand.vmem [shape: bf16[256,32], index: 5, kind: input, shape index: {}]   ;;  %s8205_s6 = inlined_call_operand.vmem [shape: bf16[6,32,128], index: 6, kind: input, shape index: {}]   ;;  %s8206_s7 = inlined_call_operand.vmem [shape: f32[1,128], index: 7, kind: input, shape index: {}]   ;;  %s8207_s8 = inlined_call_operand.vmem [shape: bf16[128,128], index: 8, kind: input, shape index: {}]   ;;  %s8208_s9 = inlined_call_operand.vmem [shape: f32[1,128], index: 9, kind: input, shape index: {}]   ;;  %s8209_s10 = inlined_call_operand.vmem [shape: f32[1,128], index: 10, kind: input, shape index: {}]   ;;  %s8210_s11 = inlined_call_operand.<no memory space> [shape: f32[1], index: 11, kind: input, shape index: {}]   ;;  %s8211_s12 = inlined_call_operand.hbm [shape: f32[1,256], index: 12, kind: output, shape index: {}]  }
   0x1   :  { %v6433_v0 = vld [vmem:[%s8205_s6 + $0x10] sm:$0xff]   ;;  %v6647_v1 = vld [vmem:[%s8205_s6 + $0x20] sm:$0xff]   ;;  %v6435_v2 = vld [vmem:[%s8205_s6 + $0x18] sm:$0xff]  }
   0x2   :  { %6000 = vmatprep.subr.bf16.mxu1 %v6433_v0  ;;  %6072 = vmatprep.subr.bf16.mxu0 %v6647_v1  ;;  %v6656_v3 = vld [vmem:[%s8205_s6 + $0x28] sm:$0xff]   ;;  %v6437_v4 = vld [vmem:[%s8200_s1] sm:$0xff]   ;;  %v6441_v8 = vld [vmem:[%s8205_s6 + $0x30] sm:$0xff]  }
   0x3   :  { %6001 = vmatpush3.bf16.msra.mxu1 %v6433_v0  ;;  %6073 = vmatpush3.bf16.msra.mxu0 %v6647_v1  ;;  %v6438_v5 = vld [vmem:[%s8201_s2] sm:$0xff]   ;;  %v6439_v6 = vld [vmem:[%s8200_s1 + $0x8] sm:$0xff]   ;;  %v6442_v9 = vld [vmem:[%s8200_s1 + $0x10] sm:$0xff]  }
   0x4   :  { %6002 = vmatprep.subr.bf16.mxu1 %v6435_v2  ;;  %6074 = vmatprep.subr.bf16.mxu0 %v6656_v3  ;;  %v6440_v7 = vld [vmem:[%s8201_s2 + $0x8] sm:$0xff]   ;;  %v6443_v10 = vld [vmem:[%s8201_s2 + $0x10] sm:$0xff]   ;;  %v6444_v11 = vld [vmem:[%s8200_s1 + $0x18] sm:$0xff]  }
   0x5   :  { %6004 = vmatprep.mubr.msk.bf16.mxu1 %vm209_vm0, %v6437_v4  ;;  %6076 = vmatprep.mubr.msk.bf16.mxu0 %vm209_vm0, %v6438_v5  ;;  %v6445_v12 = vld [vmem:[%s8201_s2 + $0x18] sm:$0xff]   ;;  %v6446_v13 = vld [vmem:[%s8200_s1 + $0x20] sm:$0xff]   ;;  %v6448_v16 = vld [vmem:[%s8200_s1 + $0x28] sm:$0xff]  }
   0x6   :  { %v6447_v14 = vld [vmem:[%s8201_s2 + $0x20] sm:$0xff]   ;;  %v6450_v15 = vld [vmem:[%s8205_s6 + $0x38] sm:$0xff]   ;;  %v6449_v17 = vld [vmem:[%s8201_s2 + $0x28] sm:$0xff]  }
   0x7   :  { %6003 = vmatpush3.bf16.msra.mxu1 %v6435_v2  ;;  %6075 = vmatpush3.bf16.msra.mxu0 %v6656_v3  ;;  %v6451_v18 = vld [vmem:[%s8200_s1 + $0x30] sm:$0xff]   ;;  %v6459_v20 = vld [vmem:[%s8205_s6 + $0x40] sm:$0xff]   ;;  %v6453_v21 = vld [vmem:[%s8200_s1 + $0x38] sm:$0xff]  }
   0x8   :  { %6108 = vmatprep.subr.bf16.mxu0 %v6441_v8  ;;  %v6452_v19 = vld [vmem:[%s8201_s2 + $0x30] sm:$0xff]   ;;  %v6454_v22 = vld [vmem:[%s8201_s2 + $0x38] sm:$0xff]   ;;  %v6455_v23 = vld [vmem:[%s8200_s1 + $0x40] sm:$0xff]  }
   0x9   :  { %v6456_v24 = vld [vmem:[%s8202_s3] sm:$0xff]   ;;  %v6457_v25 = vld [vmem:[%s8200_s1 + $0x48] sm:$0xff]   ;;  %v6460_v27 = vld [vmem:[%s8200_s1 + $0x50] sm:$0xff]  }
   0xa   :  { %6005 = vmatmul.mubr.msk.bf16.vlgmr.msra.gmra.mrb[0].mxu1 %vm209_vm0, %v6439_v6  ;;  %6077 = vmatmul.mubr.msk.bf16.vlgmr.msra.gmra.mrb[0].mxu0 %vm209_vm0, %v6440_v7  ;;  %v6458_v26 = vld [vmem:[%s8202_s3 + $0x8] sm:$0xff]   ;;  %v6471_v28 = vld [vmem:[%s8205_s6] sm:$0xff]   ;;  %v6461_v29 = vld [vmem:[%s8202_s3 + $0x10] sm:$0xff]  }
   0xb   :  { %6008 = vmatprep.mubr.msk.bf16.mxu1 %vm209_vm0, %v6442_v9  ;;  %6109 = vmatpush3.bf16.msra.mxu0 %v6441_v8  ;;  %v6473_v30 = vld [vmem:[%s8205_s6 + $0x8] sm:$0xff]   ;;  %v6462_v31 = vld [vmem:[%s8200_s1 + $0x58] sm:$0xff]   ;;  %v6464_v34 = vld [vmem:[%s8200_s1 + $0x60] sm:$0xff]  }
   0xc   :  { %6080 = vmatprep.mubr.msk.bf16.mxu0 %vm209_vm0, %v6443_v10  ;;  %6110 = vmatprep.subr.bf16.mxu0 %v6450_v15  ;;  %v6478_v32 = vld [vmem:[%s8205_s6 + $0x48] sm:$0xff]   ;;  %v6463_v33 = vld [vmem:[%s8202_s3 + $0x18] sm:$0xff]   ;;  %v6465_v35 = vld [vmem:[%s8202_s3 + $0x20] sm:$0xff]  }
   0xd   :  { %6036 = vmatprep.subr.bf16.mxu1 %v6471_v28  ;;  %v6466_v36 = vld [vmem:[%s8200_s1 + $0x68] sm:$0xff]   ;;  %v6468_v38 = vld [vmem:[%s8200_s1 + $0x70] sm:$0xff]   ;;  %v6470_v40 = vld [vmem:[%s8200_s1 + $0x78] sm:$0xff]  }
   0xe   :  { %6037 = vmatpush3.bf16.msra.mxu1 %v6471_v28  ;;  %v6467_v37 = vld [vmem:[%s8202_s3 + $0x28] sm:$0xff]   ;;  %v6469_v39 = vld [vmem:[%s8202_s3 + $0x30] sm:$0xff]   ;;  %v6472_v41 = vld [vmem:[%s8202_s3 + $0x38] sm:$0xff]  }
   0xf   :  { %6111 = vmatpush3.bf16.msra.mxu0 %v6450_v15  ;;  %6038 = vmatprep.subr.bf16.mxu1 %v6473_v30  ;;  %v6495_v42 = vld [vmem:[%s8205_s6 + $0x50] sm:$0xff]   ;;  %v6474_v43 = vld [vmem:[%s8199_s0] sm:$0xff]   ;;  %v6476_v45 = vld [vmem:[%s8199_s0 + $0x8] sm:$0xff]  }
  0x10   :  { %6144 = vmatprep.subr.bf16.mxu0 %v6459_v20  ;;  %v6475_v44 = vld [vmem:[%s8202_s3 + $0x40] sm:$0xff]   ;;  %v6477_v46 = vld [vmem:[%s8202_s3 + $0x48] sm:$0xff]   ;;  %v6479_v47 = vld [vmem:[%s8199_s0 + $0x10] sm:$0xff]  }
  0x11   :  { %v6480_v48 = vld [vmem:[%s8202_s3 + $0x50] sm:$0xff]   ;;  %v6481_v49 = vld [vmem:[%s8199_s0 + $0x18] sm:$0xff]   ;;  %v6483_v51 = vld [vmem:[%s8199_s0 + $0x20] sm:$0xff]  }
  0x12   :  { %6009 = vmatmul.mubr.msk.bf16.gmra.mrb[4].mxu1 %vm209_vm0, %v6444_v11  ;;  %6081 = vmatmul.mubr.msk.bf16.gmra.mrb[4].mxu0 %vm209_vm0, %v6445_v12  ;;  %v6482_v50 = vld [vmem:[%s8202_s3 + $0x58] sm:$0xff]   ;;  %v6484_v52 = vld [vmem:[%s8202_s3 + $0x60] sm:$0xff]   ;;  %v6485_v53 = vld [vmem:[%s8199_s0 + $0x28] sm:$0xff]  }
  0x13   :  { %6012 = vmatprep.mubr.msk.bf16.mxu1 %vm209_vm0, %v6446_v13  ;;  %6084 = vmatprep.mubr.msk.bf16.mxu0 %vm209_vm0, %v6447_v14  ;;  %v6486_v54 = vld [vmem:[%s8202_s3 + $0x68] sm:$0xff]   ;;  %v6487_v55 = vld [vmem:[%s8199_s0 + $0x30] sm:$0xff]   ;;  %v6489_v57 = vld [vmem:[%s8199_s0 + $0x38] sm:$0xff]  }
  0x14   :  { %6039 = vmatpush3.bf16.msra.mxu1 %v6473_v30  ;;  %v6488_v56 = vld [vmem:[%s8202_s3 + $0x70] sm:$0xff]   ;;  %v6490_v58 = vld [vmem:[%s8202_s3 + $0x78] sm:$0xff]   ;;  %v6491_v59 = vld [vmem:[%s8199_s0 + $0x40] sm:$0xff]  }
  0x15   :  { %6264 = vmatprep.subr.bf16.mxu1 %v6647_v1  ;;  %v6492_v60 = vld [vmem:[%s8203_s4] sm:$0xff]   ;;  %v6493_v61 = vld [vmem:[%s8199_s0 + $0x48] sm:$0xff]   ;;  %v6496_v63 = vld [vmem:[%s8199_s0 + $0x50] sm:$0xff]  }
  0x16   :  { %v6494_v62 = vld [vmem:[%s8203_s4 + $0x8] sm:$0xff]   ;;  %v6497_v0 = vld [vmem:[%s8203_s4 + $0x10] sm:$0xff]   ;;  %v6498_v2 = vld [vmem:[%s8199_s0 + $0x58] sm:$0xff]  }
  0x17   :  { %v6500_v4 = vld [vmem:[%s8199_s0 + $0x60] sm:$0xff]  }
  0x18   :  { %v6501_v5 = vld [vmem:[%s8203_s4 + $0x20] sm:$0xff]  }
  0x1a   :  { %6013 = vmatmul.mubr.msk.bf16.gmra.mrb[8].mxu1 %vm209_vm0, %v6448_v16  ;;  %6085 = vmatmul.mubr.msk.bf16.gmra.mrb[8].mxu0 %vm209_vm0, %v6449_v17 }
  0x1b   :  { %6016 = vmatprep.mubr.msk.bf16.mxu1 %vm209_vm0, %v6451_v18  ;;  %6088 = vmatprep.mubr.msk.bf16.mxu0 %vm209_vm0, %v6452_v19 }
  0x22   :  { %6017 = vmatmul.mubr.msk.bf16.gmra.mrb[12].mxu1 %vm209_vm0, %v6453_v21  ;;  %6089 = vmatmul.mubr.msk.bf16.gmra.mrb[12].mxu0 %vm209_vm0, %v6454_v22 }
  0x23   :  { %6020 = vmatprep.mubr.msk.bf16.mxu1 %vm209_vm0, %v6455_v23  ;;  %6112 = vmatprep.mubr.msk.bf16.mxu0 %vm209_vm0, %v6456_v24 }
  0x2a   :  { %6021 = vmatmul.mubr.msk.bf16.gmra.mrb[16].mxu1 %vm209_vm0, %v6457_v25  ;;  %6113 = vmatmul.mubr.msk.bf16.vlgmr.msra.gmra.mrb[0].mxu0 %vm209_vm0, %v6458_v26 }
  0x2b   :  { %6024 = vmatprep.mubr.msk.bf16.mxu1 %vm209_vm0, %v6460_v27  ;;  %6145 = vmatpush3.bf16.msra.mxu0 %v6459_v20 }
  0x2c   :  { %6116 = vmatprep.mubr.msk.bf16.mxu0 %vm209_vm0, %v6461_v29  ;;  %6146 = vmatprep.subr.bf16.mxu0 %v6478_v32 }
  0x2f   :  { %6147 = vmatpush3.bf16.msra.mxu0 %v6478_v32 }
  0x30   :  { %6180 = vmatprep.subr.bf16.mxu0 %v6495_v42 }
  0x32   :  { %6025 = vmatmul.mubr.msk.bf16.gmra.mrb[20].mxu1 %vm209_vm0, %v6462_v31  ;;  %6117 = vmatmul.mubr.msk.bf16.gmra.mrb[4].mxu0 %vm209_vm0, %v6463_v33 }
  0x33   :  { %6028 = vmatprep.mubr.msk.bf16.mxu1 %vm209_vm0, %v6464_v34  ;;  %6120 = vmatprep.mubr.msk.bf16.mxu0 %vm209_vm0, %v6465_v35 }
  0x3a   :  { %6029 = vmatmul.mubr.msk.bf16.gmra.mrb[24].mxu1 %vm209_vm0, %v6466_v36  ;;  %6121 = vmatmul.mubr.msk.bf16.gmra.mrb[8].mxu0 %vm209_vm0, %v6467_v37 }
  0x3b   :  { %6032 = vmatprep.mubr.msk.bf16.mxu1 %vm209_vm0, %v6468_v38  ;;  %6124 = vmatprep.mubr.msk.bf16.mxu0 %vm209_vm0, %v6469_v39 }
  0x42   :  { %6033 = vmatmul.mubr.msk.bf16.gmra.mrb[28].mxu1 %vm209_vm0, %v6470_v40  ;;  %6125 = vmatmul.mubr.msk.bf16.gmra.mrb[12].mxu0 %vm209_vm0, %v6472_v41 }
  0x43   :  { %6040 = vmatprep.mubr.msk.bf16.mxu1 %vm209_vm0, %v6474_v43  ;;  %6128 = vmatprep.mubr.msk.bf16.mxu0 %vm209_vm0, %v6475_v44 }
  0x4a   :  { %6041 = vmatmul.mubr.msk.bf16.vlgmr.msra.gmra.mrb[0].mxu1 %vm209_vm0, %v6476_v45  ;;  %6129 = vmatmul.mubr.msk.bf16.gmra.mrb[16].mxu0 %vm209_vm0, %v6477_v46 }
  0x4b   :  { %6044 = vmatprep.mubr.msk.bf16.mxu1 %vm209_vm0, %v6479_v47  ;;  %6132 = vmatprep.mubr.msk.bf16.mxu0 %vm209_vm0, %v6480_v48 }
  0x4c   :  { %6266 = vmatpush3.bf16.msra.mxu1 %v6647_v1  ;;  %v6512_v1 = vld [vmem:[%s8205_s6 + $0x58] sm:$0xff]  }
  0x4d   :  { %6265 = vmatprep.subr.bf16.mxu1 %v6656_v3 }
  0x50   :  { %6267 = vmatpush3.bf16.msra.mxu1 %v6656_v3  ;;  %v6499_v3 = vld [vmem:[%s8203_s4 + $0x18] sm:$0xff]  }
  0x52   :  { %6045 = vmatmul.mubr.msk.bf16.gmra.mrb[4].mxu1 %vm209_vm0, %v6481_v49  ;;  %6133 = vmatmul.mubr.msk.bf16.gmra.mrb[20].mxu0 %vm209_vm0, %v6482_v50 }
  0x53   :  { %6048 = vmatprep.mubr.msk.bf16.mxu1 %vm209_vm0, %v6483_v51  ;;  %6136 = vmatprep.mubr.msk.bf16.mxu0 %vm209_vm0, %v6484_v52 }
  0x5a   :  { %6049 = vmatmul.mubr.msk.bf16.gmra.mrb[8].mxu1 %vm209_vm0, %v6485_v53  ;;  %6137 = vmatmul.mubr.msk.bf16.gmra.mrb[24].mxu0 %vm209_vm0, %v6486_v54 }
  0x5b   :  { %6052 = vmatprep.mubr.msk.bf16.mxu1 %vm209_vm0, %v6487_v55  ;;  %6140 = vmatprep.mubr.msk.bf16.mxu0 %vm209_vm0, %v6488_v56 }
  0x62   :  { %6053 = vmatmul.mubr.msk.bf16.gmra.mrb[12].mxu1 %vm209_vm0, %v6489_v57  ;;  %6141 = vmatmul.mubr.msk.bf16.gmra.mrb[28].mxu0 %vm209_vm0, %v6490_v58 }
  0x63   :  { %6056 = vmatprep.mubr.msk.bf16.mxu1 %vm209_vm0, %v6491_v59  ;;  %6148 = vmatprep.mubr.msk.bf16.mxu0 %vm209_vm0, %v6492_v60 }
  0x6a   :  { %6057 = vmatmul.mubr.msk.bf16.gmra.mrb[16].mxu1 %vm209_vm0, %v6493_v61  ;;  %6149 = vmatmul.mubr.msk.bf16.vlgmr.msra.gmra.mrb[0].mxu0 %vm209_vm0, %v6494_v62 }
  0x6b   :  { %6060 = vmatprep.mubr.msk.bf16.mxu1 %vm209_vm0, %v6496_v63  ;;  %6181 = vmatpush3.bf16.msra.mxu0 %v6495_v42 }
  0x6c   :  { %6152 = vmatprep.mubr.msk.bf16.mxu0 %vm209_vm0, %v6497_v0  ;;  %6182 = vmatprep.subr.bf16.mxu0 %v6512_v1 }
  0x6f   :  { %6183 = vmatpush3.bf16.msra.mxu0 %v6512_v1 }
  0x70   :  { %18 = vsyncpa [#allocation4], 0  ;;  %v6502_v6 = vld [vmem:[%s8199_s0 + $0x68] sm:$0xff]   ;;  %v6504_v8 = vld [vmem:[%s8199_s0 + $0x70] sm:$0xff]   ;;  %vm5419_vm1 = vcmask 130112   ;;  %vm5426_vm2 = vcmask 195712  }
  0x71   :  { %v6503_v7 = vld [vmem:[%s8203_s4 + $0x28] sm:$0xff]   ;;  %v6505_v9 = vld [vmem:[%s8203_s4 + $0x30] sm:$0xff]   ;;  %v6506_v10 = vld [vmem:[%s8199_s0 + $0x78] sm:$0xff]   ;;  %vm5433_vm3 = vcmask 261312   ;;  %vm5440_vm4 = vcmask 326912   ;;  %vm5447_vm5 = vcmask 392512  }
  0x72   :  { %6061 = vmatmul.mubr.msk.bf16.gmra.mrb[20].mxu1 %vm209_vm0, %v6498_v2  ;;  %6153 = vmatmul.mubr.msk.bf16.gmra.mrb[4].mxu0 %vm209_vm0, %v6499_v3  ;;  %v6507_v11 = vld [vmem:[%s8203_s4 + $0x38] sm:$0xff]   ;;  %v6508_v12 = vld [vmem:[%s8201_s2 + $0x40] sm:$0xff]   ;;  %v6510_v14 = vld [vmem:[%s8201_s2 + $0x48] sm:$0xff]   ;;  %vm5454_vm6 = vcmask 458112   ;;  %vm5461_vm7 = vcmask 523712   ;;  %vm5468_vm8 = vcmask 589312  }
  0x73   :  { %6064 = vmatprep.mubr.msk.bf16.mxu1 %vm209_vm0, %v6500_v4  ;;  %6156 = vmatprep.mubr.msk.bf16.mxu0 %vm209_vm0, %v6501_v5  ;;  %v6509_v13 = vld [vmem:[%s8203_s4 + $0x40] sm:$0xff]   ;;  %v6511_v15 = vld [vmem:[%s8203_s4 + $0x48] sm:$0xff]   ;;  %v6513_v16 = vld [vmem:[%s8201_s2 + $0x50] sm:$0xff]   ;;  %vm5475_vm9 = vcmask 654912   ;;  %vm5482_vm10 = vcmask 720512   ;;  %vm5489_vm11 = vcmask 786112  }
  0x74   :  { %v6514_v17 = vld [vmem:[%s8203_s4 + $0x50] sm:$0xff]   ;;  %v6515_v18 = vld [vmem:[%s8201_s2 + $0x58] sm:$0xff]   ;;  %v6517_v20 = vld [vmem:[%s8201_s2 + $0x60] sm:$0xff]   ;;  %vm5496_vm12 = vcmask 851712   ;;  %vm5503_vm13 = vcmask 917312   ;;  %vm5510_vm14 = vcmask 982912  }
  0x75   :  { %v6516_v19 = vld [vmem:[%s8203_s4 + $0x58] sm:$0xff]   ;;  %v6518_v21 = vld [vmem:[%s8203_s4 + $0x60] sm:$0xff]   ;;  %v6519_v22 = vld [vmem:[%s8201_s2 + $0x68] sm:$0xff]   ;;  %vm5517_vm15 = vcmask 1048512  }
  0x76   :  { %v6520_v23 = vld [vmem:[%s8203_s4 + $0x68] sm:$0xff]   ;;  %v6521_v24 = vld [vmem:[%s8201_s2 + $0x70] sm:$0xff]   ;;  %v6523_v26 = vld [vmem:[%s8201_s2 + $0x78] sm:$0xff]  }
  0x77   :  { %v6522_v25 = vld [vmem:[%s8203_s4 + $0x70] sm:$0xff]   ;;  %v6524_v27 = vld [vmem:[%s8203_s4 + $0x78] sm:$0xff]   ;;  %v6525_v28 = vld [vmem:[%s8204_s5] sm:$0xff]  }
  0x78   :  { %v6526_v29 = vld [vmem:[%s8204_s5 + $0x8] sm:$0xff]   ;;  %v6527_v30 = vld [vmem:[%s8204_s5 + $0x10] sm:$0xff]   ;;  %v6528_v31 = vld [vmem:[%s8204_s5 + $0x18] sm:$0xff]  }
  0x79   :  { %v6529_v32 = vld [vmem:[%s8204_s5 + $0x20] sm:$0xff]   ;;  %v6530_v33 = vld [vmem:[%s8204_s5 + $0x28] sm:$0xff]   ;;  %v6531_v34 = vld [vmem:[%s8204_s5 + $0x30] sm:$0xff]  }
  0x7a   :  { %6065 = vmatmul.mubr.msk.bf16.gmra.mrb[24].mxu1 %vm209_vm0, %v6502_v6  ;;  %6157 = vmatmul.mubr.msk.bf16.gmra.mrb[8].mxu0 %vm209_vm0, %v6503_v7  ;;  %v6532_v35 = vld [vmem:[%s8204_s5 + $0x38] sm:$0xff]   ;;  %v6533_v36 = vld [vmem:[%s8204_s5 + $0x40] sm:$0xff]   ;;  %v6534_v37 = vld [vmem:[%s8204_s5 + $0x48] sm:$0xff]  }
  0x7b   :  { %6068 = vmatprep.mubr.msk.bf16.mxu1 %vm209_vm0, %v6504_v8  ;;  %6160 = vmatprep.mubr.msk.bf16.mxu0 %vm209_vm0, %v6505_v9  ;;  %v6535_v38 = vld [vmem:[%s8204_s5 + $0x50] sm:$0xff]   ;;  %v6536_v39 = vld [vmem:[%s8204_s5 + $0x58] sm:$0xff]   ;;  %v6537_v40 = vld [vmem:[%s8204_s5 + $0x60] sm:$0xff]  }
  0x7c   :  { %v6538_v41 = vld [vmem:[%s8204_s5 + $0x68] sm:$0xff]   ;;  %v6539_v42 = vld [vmem:[%s8204_s5 + $0x70] sm:$0xff]   ;;  %v6540_v43 = vld [vmem:[%s8204_s5 + $0x78] sm:$0xff]  }
  0x7d   :  { %v6541_v44 = vld [vmem:[%s8207_s8] sm:$0xff]   ;;  %v6542_v45 = vld [vmem:[%s8207_s8 + $0x8] sm:$0xff]   ;;  %v6543_v46 = vld [vmem:[%s8207_s8 + $0x10] sm:$0xff]  }
  0x7e   :  { %6216 = vmatprep.subr.bf16.mxu1 %v6541_v44  ;;  %v6544_v47 = vld [vmem:[%s8207_s8 + $0x18] sm:$0xff]   ;;  %v6545_v48 = vld [vmem:[%s8207_s8 + $0x20] sm:$0xff]   ;;  %v6546_v49 = vld [vmem:[%s8207_s8 + $0x28] sm:$0xff]  }
  0x7f   :  { %v6547_v50 = vld [vmem:[%s8207_s8 + $0x30] sm:$0xff]   ;;  %v6548_v51 = vld [vmem:[%s8207_s8 + $0x38] sm:$0xff]  }
  0x82   :  { %6069 = vmatmul.mubr.msk.bf16.gmra.mrb[28].mxu1 %vm209_vm0, %v6506_v10  ;;  %6161 = vmatmul.mubr.msk.bf16.gmra.mrb[12].mxu0 %vm209_vm0, %v6507_v11 }
  0x83   :  { %6092 = vmatprep.mubr.msk.bf16.mxu1 %vm209_vm0, %v6508_v12  ;;  %6164 = vmatprep.mubr.msk.bf16.mxu0 %vm209_vm0, %v6509_v13 }
  0x8a   :  { %6093 = vmatmul.mubr.msk.bf16.vlgmr.msra.gmra.mrb[16].mxu1 %vm209_vm0, %v6510_v14  ;;  %6165 = vmatmul.mubr.msk.bf16.gmra.mrb[16].mxu0 %vm209_vm0, %v6511_v15 }
  0x8b   :  { %6096 = vmatprep.mubr.msk.bf16.mxu1 %vm209_vm0, %v6513_v16  ;;  %6168 = vmatprep.mubr.msk.bf16.mxu0 %vm209_vm0, %v6514_v17 }
  0x8c   :  { %6217 = vmatpush3.bf16.msra.mxu1 %v6541_v44 }
  0x8d   :  { %6218 = vmatprep.subr.bf16.mxu1 %v6542_v45 }
  0x90   :  { %6219 = vmatpush3.bf16.msra.mxu1 %v6542_v45 }
  0x91   :  { %6220 = vmatprep.subr.bf16.mxu1 %v6543_v46 }
  0x92   :  { %6097 = vmatmul.mubr.msk.bf16.gmra.mrb[20].mxu1 %vm209_vm0, %v6515_v18  ;;  %6169 = vmatmul.mubr.msk.bf16.gmra.mrb[20].mxu0 %vm209_vm0, %v6516_v19 }
  0x93   :  { %6100 = vmatprep.mubr.msk.bf16.mxu1 %vm209_vm0, %v6517_v20  ;;  %6172 = vmatprep.mubr.msk.bf16.mxu0 %vm209_vm0, %v6518_v21  ;;  %v7146_v21 = vld [vmem:[%s8206_s7] ss:$0 sm:$0xff] }
  0x94   :  { %6221 = vmatpush3.bf16.msra.mxu1 %v6543_v46 }
  0x95   :  { %6222 = vmatprep.subr.bf16.mxu1 %v6544_v47 }
  0x98   :  { %6223 = vmatpush3.bf16.msra.mxu1 %v6544_v47 }
  0x99   :  { %6224 = vmatprep.subr.bf16.mxu1 %v6545_v48 }
  0x9a   :  { %6101 = vmatmul.mubr.msk.bf16.gmra.mrb[24].mxu1 %vm209_vm0, %v6519_v22  ;;  %6173 = vmatmul.mubr.msk.bf16.gmra.mrb[24].mxu0 %vm209_vm0, %v6520_v23 }
  0x9b   :  { %6104 = vmatprep.mubr.msk.bf16.mxu1 %vm209_vm0, %v6521_v24  ;;  %6176 = vmatprep.mubr.msk.bf16.mxu0 %vm209_vm0, %v6522_v25 }
  0x9c   :  { %6225 = vmatpush3.bf16.msra.mxu1 %v6545_v48 }
  0x9d   :  { %6226 = vmatprep.subr.bf16.mxu1 %v6546_v49 }
  0xa0   :  { %6227 = vmatpush3.bf16.msra.mxu1 %v6546_v49 }
  0xa1   :  { %6228 = vmatprep.subr.bf16.mxu1 %v6547_v50 }
  0xa2   :  { %6105 = vmatmul.mubr.msk.bf16.gmra.mrb[28].mxu1 %vm209_vm0, %v6523_v26  ;;  %6177 = vmatmul.mubr.msk.bf16.gmra.mrb[28].mxu0 %vm209_vm0, %v6524_v27 }
  0xa3   :  { %6184 = vmatprep.mubr.msk.bf16.mxu0 %vm209_vm0, %v6525_v28 }
  0xa4   :  { %6229 = vmatpush3.bf16.msra.mxu1 %v6547_v50 }
  0xa5   :  { %6230 = vmatprep.subr.bf16.mxu1 %v6548_v51 }
  0xa8   :  { %6231 = vmatpush3.bf16.msra.mxu1 %v6548_v51 }
  0xaa   :  { %6185 = vmatmul.mubr.msk.bf16.vlgmr.msra.gmra.mrb[0].mxu0 %vm209_vm0, %v6526_v29 }
  0xab   :  { %6188 = vmatprep.mubr.msk.bf16.mxu0 %vm209_vm0, %v6527_v30 }
  0xb2   :  { %6189 = vmatmul.mubr.msk.bf16.gmra.mrb[4].mxu0 %vm209_vm0, %v6528_v31 }
  0xb3   :  { %6192 = vmatprep.mubr.msk.bf16.mxu0 %vm209_vm0, %v6529_v32 }
  0xba   :  { %6193 = vmatmul.mubr.msk.bf16.gmra.mrb[8].mxu0 %vm209_vm0, %v6530_v33 }
  0xbb   :  { %6196 = vmatprep.mubr.msk.bf16.mxu0 %vm209_vm0, %v6531_v34 }
  0xc2   :  { %6197 = vmatmul.mubr.msk.bf16.gmra.mrb[12].mxu0 %vm209_vm0, %v6532_v35 }
  0xc3   :  { %6200 = vmatprep.mubr.msk.bf16.mxu0 %vm209_vm0, %v6533_v36 }
  0xca   :  { %6201 = vmatmul.mubr.msk.bf16.gmra.mrb[16].mxu0 %vm209_vm0, %v6534_v37 }
  0xcb   :  { %6204 = vmatprep.mubr.msk.bf16.mxu0 %vm209_vm0, %v6535_v38 }
  0xd2   :  { %6205 = vmatmul.mubr.msk.bf16.gmra.mrb[20].mxu0 %vm209_vm0, %v6536_v39 }
  0xd3   :  { %6208 = vmatprep.mubr.msk.bf16.mxu0 %vm209_vm0, %v6537_v40 }
  0xda   :  { %6209 = vmatmul.mubr.msk.bf16.gmra.mrb[24].mxu0 %vm209_vm0, %v6538_v41 }
  0xdb   :  { %6212 = vmatprep.mubr.msk.bf16.mxu0 %vm209_vm0, %v6539_v42 }
  0xe2   :  { %6213 = vmatmul.mubr.msk.bf16.gmra.mrb[28].mxu0 %vm209_vm0, %v6540_v43 }
 0x11d   :  { %v6042_v52 = vpop.f32.mrb[0].mxu1 }
 0x11e   :  { %v593_v53 = vpop.f32.mrb[1].mxu1 }
 0x11f   :  { %v6043_v54 = vpop.f32.mrb[2].mxu1 }
 0x120   :  { %v596_v55 = vpop.f32.mrb[3].mxu1 }
 0x125   :  { %v6046_v56 = vpop.f32.mrb[4].mxu1 }
 0x126   :  { %v609_v57 = vpop.f32.mrb[5].mxu1 }
 0x127   :  { %v6047_v58 = vpop.f32.mrb[6].mxu1 }
 0x128   :  { %v612_v59 = vpop.f32.mrb[7].mxu1 }
 0x12d   :  { %v6050_v60 = vpop.f32.mrb[8].mxu1 }
 0x12e   :  { %v7097_v61 = vpop.f32.mrb[9].mxu1 }
 0x12f   :  { %v7099_v62 = vpop.f32.mrb[10].mxu1 }
 0x130   :  { %v7101_v63 = vpop.f32.mrb[11].mxu1 }
 0x135   :  { %v7103_v0 = vpop.f32.mrb[12].mxu1 }
 0x136   :  { %v7105_v1 = vpop.f32.mrb[13].mxu1 }
 0x137   :  { %v7107_v2 = vpop.f32.mrb[14].mxu1 }
 0x138   :  { %v7109_v3 = vpop.f32.mrb[15].mxu1 }
 0x15d   :  { %v7111_v4 = vpop.f32.mrb[16].mxu1 }
 0x15e   :  { %v7113_v5 = vpop.f32.mrb[17].mxu1 }
 0x15f   :  { %v7115_v6 = vpop.f32.mrb[18].mxu1 }
 0x160   :  { %v7117_v7 = vpop.f32.mrb[19].mxu1 }
 0x165   :  { %v7119_v8 = vpop.f32.mrb[20].mxu1 }
 0x166   :  { %v7121_v9 = vpop.f32.mrb[21].mxu1 }
 0x167   :  { %v7123_v10 = vpop.f32.mrb[22].mxu1 }
 0x168   :  { %v7125_v11 = vpop.f32.mrb[23].mxu1 }
 0x16d   :  { %v7127_v12 = vpop.f32.mrb[24].mxu1 }
 0x16e   :  { %v7129_v13 = vpop.f32.mrb[25].mxu1 }
 0x16f   :  { %v7131_v14 = vpop.f32.mrb[26].mxu1 }
 0x170   :  { %v7133_v15 = vpop.f32.mrb[27].mxu1 }
 0x175   :  { %v7135_v16 = vpop.f32.mrb[28].mxu1 }
 0x176   :  { %v7137_v17 = vpop.f32.mrb[29].mxu1 }
 0x177   :  { %v7139_v18 = vpop.f32.mrb[30].mxu1 }
 0x178   :  { %v7141_v19 = vpop.f32.mrb[31].mxu1 }
 0x17d   :  { %v6186_v20 = vpop.f32.mrb[0].mxu0 }
 0x17e   :  { %v6268_v22 = vadd.f32 %v6186_v20, %v6042_v52  ;;  %v2041_v23 = vpop.f32.mrb[1].mxu0 }
 0x17f   :  { %v6269_v24 = vadd.f32 %v2041_v23, %v593_v53  ;;  %v6187_v25 = vpop.f32.mrb[2].mxu0 }
 0x180   :  { %v2209_v26 = vadd.f32 %v6268_v22, %v7146_v21  ;;  %v6270_v27 = vadd.f32 %v6187_v25, %v6043_v54  ;;  %v2044_v28 = vpop.f32.mrb[3].mxu0 }
 0x181   :  { %v2207_v29 = vadd.f32 %v6269_v24, %v7146_v21  ;;  %v6271_v30 = vadd.f32 %v2044_v28, %v596_v55 }
 0x182   :  { %v2210_v31 = vadd.f32 %v6270_v27, %v7146_v21  ;;  %v2241_v33 = vmax.f32 %v2209_v26, 0.0 }
 0x183   :  { %v2208_v32 = vadd.f32 %v6271_v30, %v7146_v21  ;;  %v2239_v35 = vmax.f32 %v2207_v29, 0.0 }
 0x184   :  { %v2242_v34 = vmax.f32 %v2210_v31, 0.0 }
 0x185   :  { %v2240_v36 = vmax.f32 %v2208_v32, 0.0  ;;  %v6190_v37 = vpop.f32.mrb[4].mxu0 }
 0x186   :  { %v2272_v38 = vpack.c.bf16 %v2242_v34, %v2241_v33  ;;  %v6272_v39 = vadd.f32 %v6190_v37, %v6046_v56  ;;  %v2057_v40 = vpop.f32.mrb[5].mxu0 }
 0x187   :  { %v6273_v41 = vadd.f32 %v2057_v40, %v609_v57  ;;  %v6191_v42 = vpop.f32.mrb[6].mxu0  ;;  %v2271_v43 = vpack.c.bf16 %v2240_v36, %v2239_v35 }
 0x188   :  { %v2213_v44 = vadd.f32 %v6272_v39, %v7146_v21  ;;  %v6274_v45 = vadd.f32 %v6191_v42, %v6047_v58  ;;  %v2060_v46 = vpop.f32.mrb[7].mxu0 }
 0x189   :  { %v2211_v47 = vadd.f32 %v6273_v41, %v7146_v21  ;;  %v6275_v48 = vadd.f32 %v2060_v46, %v612_v59  ;;  %6232 = vmatprep.mubr.bf16.mxu1 %v2271_v43 }
 0x18a   :  { %v2214_v49 = vadd.f32 %v6274_v45, %v7146_v21  ;;  %6233 = vmatmul.mubr.bf16.vlgmr.msra.gmra.mrb[32].mxu1 %v2272_v38  ;;  %v2245_v51 = vmax.f32 %v2213_v44, 0.0 }
 0x18b   :  { %v2212_v50 = vadd.f32 %v6275_v48, %v7146_v21  ;;  %v2243_v53 = vmax.f32 %v2211_v47, 0.0 }
 0x18c   :  { %v2246_v52 = vmax.f32 %v2214_v49, 0.0 }
 0x18d   :  { %v2244_v54 = vmax.f32 %v2212_v50, 0.0  ;;  %v6194_v55 = vpop.f32.mrb[8].mxu0 }
 0x18e   :  { %v6276_v56 = vadd.f32 %v6194_v55, %v6050_v60  ;;  %v2073_v57 = vpop.f32.mrb[9].mxu0  ;;  %v2274_v20 = vpack.c.bf16 %v2246_v52, %v2245_v51 }
 0x18f   :  { %v6277_v58 = vadd.f32 %v2073_v57, %v7097_v61  ;;  %v6195_v22 = vpop.f32.mrb[10].mxu0  ;;  %v2273_v23 = vpack.c.bf16 %v2244_v54, %v2243_v53 }
 0x190   :  { %v2217_v59 = vadd.f32 %v6276_v56, %v7146_v21  ;;  %v6278_v24 = vadd.f32 %v6195_v22, %v7099_v62  ;;  %v2076_v25 = vpop.f32.mrb[11].mxu0 }
 0x191   :  { %v2215_v26 = vadd.f32 %v6277_v58, %v7146_v21  ;;  %v6279_v27 = vadd.f32 %v2076_v25, %v7101_v63  ;;  %6236 = vmatprep.mubr.bf16.mxu1 %v2273_v23 }
 0x192   :  { %v2218_v28 = vadd.f32 %v6278_v24, %v7146_v21  ;;  %6237 = vmatmul.mubr.bf16.gmra.mrb[36].mxu1 %v2274_v20  ;;  %v2249_v29 = vmax.f32 %v2217_v59, 0.0 }
 0x193   :  { %v2216_v60 = vadd.f32 %v6279_v27, %v7146_v21  ;;  %v2247_v61 = vmax.f32 %v2215_v26, 0.0 }
 0x194   :  { %v2250_v30 = vmax.f32 %v2218_v28, 0.0 }
 0x195   :  { %v2248_v31 = vmax.f32 %v2216_v60, 0.0  ;;  %v6198_v32 = vpop.f32.mrb[12].mxu0 }
 0x196   :  { %v6280_v33 = vadd.f32 %v6198_v32, %v7103_v0  ;;  %v2089_v34 = vpop.f32.mrb[13].mxu0  ;;  %v2276_v62 = vpack.c.bf16 %v2250_v30, %v2249_v29 }
 0x197   :  { %v6281_v35 = vadd.f32 %v2089_v34, %v7105_v1  ;;  %v6199_v36 = vpop.f32.mrb[14].mxu0  ;;  %v2275_v37 = vpack.c.bf16 %v2248_v31, %v2247_v61 }
 0x198   :  { %v2221_v63 = vadd.f32 %v6280_v33, %v7146_v21  ;;  %v6282_v38 = vadd.f32 %v6199_v36, %v7107_v2  ;;  %v2092_v39 = vpop.f32.mrb[15].mxu0 }
 0x199   :  { %v2219_v40 = vadd.f32 %v6281_v35, %v7146_v21  ;;  %v6283_v41 = vadd.f32 %v2092_v39, %v7109_v3  ;;  %6240 = vmatprep.mubr.bf16.mxu1 %v2275_v37 }
 0x19a   :  { %v2222_v42 = vadd.f32 %v6282_v38, %v7146_v21  ;;  %6241 = vmatmul.mubr.bf16.gmra.mrb[40].mxu1 %v2276_v62  ;;  %v2253_v43 = vmax.f32 %v2221_v63, 0.0 }
 0x19b   :  { %v2220_v0 = vadd.f32 %v6283_v41, %v7146_v21  ;;  %v2251_v1 = vmax.f32 %v2219_v40, 0.0 }
 0x19c   :  { %v2254_v44 = vmax.f32 %v2222_v42, 0.0 }
 0x19d   :  { %v2252_v45 = vmax.f32 %v2220_v0, 0.0  ;;  %v6202_v46 = vpop.f32.mrb[16].mxu0 }
 0x19e   :  { %v6284_v47 = vadd.f32 %v6202_v46, %v7111_v4  ;;  %v2105_v48 = vpop.f32.mrb[17].mxu0  ;;  %v2278_v2 = vpack.c.bf16 %v2254_v44, %v2253_v43 }
 0x19f   :  { %v6285_v49 = vadd.f32 %v2105_v48, %v7113_v5  ;;  %v6203_v50 = vpop.f32.mrb[18].mxu0  ;;  %v2277_v51 = vpack.c.bf16 %v2252_v45, %v2251_v1 }
 0x1a0   :  { %v2225_v3 = vadd.f32 %v6284_v47, %v7146_v21  ;;  %v6286_v52 = vadd.f32 %v6203_v50, %v7115_v6  ;;  %v2108_v53 = vpop.f32.mrb[19].mxu0 }
 0x1a1   :  { %v2223_v54 = vadd.f32 %v6285_v49, %v7146_v21  ;;  %v6287_v55 = vadd.f32 %v2108_v53, %v7117_v7  ;;  %6244 = vmatprep.mubr.bf16.mxu1 %v2277_v51 }
 0x1a2   :  { %v2226_v56 = vadd.f32 %v6286_v52, %v7146_v21  ;;  %6245 = vmatmul.mubr.bf16.gmra.mrb[44].mxu1 %v2278_v2  ;;  %v2257_v57 = vmax.f32 %v2225_v3, 0.0 }
 0x1a3   :  { %v2224_v4 = vadd.f32 %v6287_v55, %v7146_v21  ;;  %v2255_v5 = vmax.f32 %v2223_v54, 0.0 }
 0x1a4   :  { %v2258_v20 = vmax.f32 %v2226_v56, 0.0 }
 0x1a5   :  { %v2256_v58 = vmax.f32 %v2224_v4, 0.0  ;;  %v6206_v22 = vpop.f32.mrb[20].mxu0 }
 0x1a6   :  { %v6288_v23 = vadd.f32 %v6206_v22, %v7119_v8  ;;  %v2121_v59 = vpop.f32.mrb[21].mxu0  ;;  %v2280_v6 = vpack.c.bf16 %v2258_v20, %v2257_v57 }
 0x1a7   :  { %v6289_v24 = vadd.f32 %v2121_v59, %v7121_v9  ;;  %v6207_v25 = vpop.f32.mrb[22].mxu0  ;;  %v2279_v26 = vpack.c.bf16 %v2256_v58, %v2255_v5  ;;  %v7213_v5 = vld [vmem:[%s8209_s10] ss:$0 sm:$0xff] }
 0x1a8   :  { %v2229_v7 = vadd.f32 %v6288_v23, %v7146_v21  ;;  %v6290_v27 = vadd.f32 %v6207_v25, %v7123_v10  ;;  %v2124_v28 = vpop.f32.mrb[23].mxu0 }
 0x1a9   :  { %v2227_v60 = vadd.f32 %v6289_v24, %v7146_v21  ;;  %v6291_v29 = vadd.f32 %v2124_v28, %v7125_v11  ;;  %6248 = vmatprep.mubr.bf16.mxu1 %v2279_v26 }
 0x1aa   :  { %v2230_v30 = vadd.f32 %v6290_v27, %v7146_v21  ;;  %6249 = vmatmul.mubr.bf16.gmra.mrb[48].mxu1 %v2280_v6  ;;  %v2261_v61 = vmax.f32 %v2229_v7, 0.0 }
 0x1ab   :  { %v2228_v8 = vadd.f32 %v6291_v29, %v7146_v21  ;;  %v2259_v9 = vmax.f32 %v2227_v60, 0.0 }
 0x1ac   :  { %v2262_v31 = vmax.f32 %v2230_v30, 0.0 }
 0x1ad   :  { %v2260_v32 = vmax.f32 %v2228_v8, 0.0  ;;  %v6210_v33 = vpop.f32.mrb[24].mxu0 }
 0x1ae   :  { %v6292_v34 = vadd.f32 %v6210_v33, %v7127_v12  ;;  %v2137_v62 = vpop.f32.mrb[25].mxu0  ;;  %v2282_v10 = vpack.c.bf16 %v2262_v31, %v2261_v61 }
 0x1af   :  { %v6293_v35 = vadd.f32 %v2137_v62, %v7129_v13  ;;  %v6211_v36 = vpop.f32.mrb[26].mxu0  ;;  %v2281_v37 = vpack.c.bf16 %v2260_v32, %v2259_v9 }
 0x1b0   :  { %v2233_v11 = vadd.f32 %v6292_v34, %v7146_v21  ;;  %v6294_v63 = vadd.f32 %v6211_v36, %v7131_v14  ;;  %v2140_v38 = vpop.f32.mrb[27].mxu0 }
 0x1b1   :  { %v2231_v39 = vadd.f32 %v6293_v35, %v7146_v21  ;;  %v6295_v40 = vadd.f32 %v2140_v38, %v7133_v15  ;;  %6252 = vmatprep.mubr.bf16.mxu1 %v2281_v37 }
 0x1b2   :  { %v2234_v41 = vadd.f32 %v6294_v63, %v7146_v21  ;;  %6253 = vmatmul.mubr.bf16.gmra.mrb[52].mxu1 %v2282_v10  ;;  %v2265_v42 = vmax.f32 %v2233_v11, 0.0 }
 0x1b3   :  { %v2232_v12 = vadd.f32 %v6295_v40, %v7146_v21  ;;  %v2263_v13 = vmax.f32 %v2231_v39, 0.0 }
 0x1b4   :  { %v2266_v0 = vmax.f32 %v2234_v41, 0.0 }
 0x1b5   :  { %v2264_v43 = vmax.f32 %v2232_v12, 0.0  ;;  %v6214_v44 = vpop.f32.mrb[28].mxu0 }
 0x1b6   :  { %v6296_v1 = vadd.f32 %v6214_v44, %v7135_v16  ;;  %v2153_v45 = vpop.f32.mrb[29].mxu0  ;;  %v2284_v14 = vpack.c.bf16 %v2266_v0, %v2265_v42 }
 0x1b7   :  { %v6297_v46 = vadd.f32 %v2153_v45, %v7137_v17  ;;  %v6215_v47 = vpop.f32.mrb[30].mxu0  ;;  %v2283_v48 = vpack.c.bf16 %v2264_v43, %v2263_v13 }
 0x1b8   :  { %v2237_v15 = vadd.f32 %v6296_v1, %v7146_v21  ;;  %v6298_v2 = vadd.f32 %v6215_v47, %v7139_v18  ;;  %v2156_v49 = vpop.f32.mrb[31].mxu0  ;;  %v7206_v18 = vld [vmem:[%s8208_s9] ss:$0 sm:$0xff] }
 0x1b9   :  { %v2235_v50 = vadd.f32 %v6297_v46, %v7146_v21  ;;  %v6299_v51 = vadd.f32 %v2156_v49, %v7141_v19  ;;  %6256 = vmatprep.mubr.bf16.mxu1 %v2283_v48 }
 0x1ba   :  { %v2238_v3 = vadd.f32 %v6298_v2, %v7146_v21  ;;  %6257 = vmatmul.mubr.bf16.gmra.mrb[56].mxu1 %v2284_v14  ;;  %v2269_v52 = vmax.f32 %v2237_v15, 0.0 }
 0x1bb   :  { %v2236_v16 = vadd.f32 %v6299_v51, %v7146_v21  ;;  %v2267_v17 = vmax.f32 %v2235_v50, 0.0 }
 0x1bc   :  { %v2270_v53 = vmax.f32 %v2238_v3, 0.0 }
 0x1bd   :  { %v2268_v54 = vmax.f32 %v2236_v16, 0.0 }
 0x1be   :  { %v2286_v55 = vpack.c.bf16 %v2270_v53, %v2269_v52 }
 0x1bf   :  { %v2285_v56 = vpack.c.bf16 %v2268_v54, %v2267_v17 }
 0x1c1   :  { %6260 = vmatprep.mubr.bf16.mxu1 %v2285_v56 }
 0x1c2   :  { %6261 = vmatmul.mubr.bf16.gmra.mrb[60].mxu1 %v2286_v55 }
 0x25d   :  { %v6234_v19 = vpop.f32.mrb[32].mxu1 }
 0x25e   :  { %v2401_v4 = vadd.f32 %v6234_v19, %v7206_v18  ;;  %v2392_v57 = vpop.f32.mrb[33].mxu1 }
 0x25f   :  { %v2393_v20 = vadd.f32 %v7206_v18, %v2392_v57  ;;  %v6235_v21 = vpop.f32.mrb[34].mxu1 }
 0x260   :  { %v2521_v58 = vmax.f32 %v2401_v4, 0.0  ;;  %v2404_v22 = vadd.f32 %v6235_v21, %v7206_v18  ;;  %v2395_v23 = vpop.f32.mrb[35].mxu1 }
 0x261   :  { %v2519_v59 = vmax.f32 %v2393_v20, 0.0  ;;  %v2396_v6 = vadd.f32 %v7206_v18, %v2395_v23 }
 0x262   :  { %v2522_v24 = vmax.f32 %v2404_v22, 0.0  ;;  %v2560_v25 = vmul.f32 %v7213_v5, %v2521_v58  ;;  %v6573_v22 = vmov 0  }
 0x263   :  { %v2520_v26 = vmax.f32 %v2396_v6, 0.0  ;;  %v2558_v7 = vmul.f32 %v7213_v5, %v2519_v59  ;;  %6431 = vset.pattern.permute.xlu1 %v6573_v22  ;;  %6432 = vset.pattern.permute.xlu0 %v6573_v22  ;;  %v6574_v22 = vmov 1966171168  }
 0x264   :  { %2594 = vadd.xlane.f32.xlu1 %v2560_v25  ;;  %v2561_v29 = vmul.f32 %v7213_v5, %v2522_v24 }
 0x265   :  { %v6238_v27 = vpop.f32.mrb[36].mxu1  ;;  %2590 = vadd.xlane.f32.xlu0 %v2558_v7  ;;  %v2559_v61 = vmul.f32 %v7213_v5, %v2520_v26 }
 0x266   :  { %v2417_v28 = vadd.f32 %v6238_v27, %v7206_v18  ;;  %v2408_v60 = vpop.f32.mrb[37].mxu1 }
 0x267   :  { %v2409_v30 = vadd.f32 %v7206_v18, %v2408_v60  ;;  %v6239_v8 = vpop.f32.mrb[38].mxu1 }
 0x268   :  { %v2525_v31 = vmax.f32 %v2417_v28, 0.0  ;;  %v2420_v9 = vadd.f32 %v6239_v8, %v7206_v18  ;;  %2596 = vadd.xlane.f32.xlu1 %v2561_v29  ;;  %v2411_v32 = vpop.f32.mrb[39].mxu1 }
 0x269   :  { %v2412_v33 = vadd.f32 %v7206_v18, %v2411_v32  ;;  %2592 = vadd.xlane.f32.xlu0 %v2559_v61  ;;  %v2523_v10 = vmax.f32 %v2409_v30, 0.0 }
 0x26a   :  { %v2526_v34 = vmax.f32 %v2420_v9, 0.0  ;;  %v2564_v62 = vmul.f32 %v7213_v5, %v2525_v31 }
 0x26b   :  { %v2524_v35 = vmax.f32 %v2412_v33, 0.0  ;;  %v2562_v40 = vmul.f32 %v7213_v5, %v2523_v10 }
 0x26c   :  { %v2565_v36 = vmul.f32 %v7213_v5, %v2526_v34 }
 0x26d   :  { %v6242_v37 = vpop.f32.mrb[40].mxu1  ;;  %2602 = vadd.xlane.f32.xlu0 %v2564_v62  ;;  %v2563_v0 = vmul.f32 %v7213_v5, %v2524_v35 }
 0x26e   :  { %v2433_v11 = vadd.f32 %v6242_v37, %v7206_v18  ;;  %2604 = vadd.xlane.f32.xlu1 %v2565_v36  ;;  %v2424_v63 = vpop.f32.mrb[41].mxu1 }
 0x26f   :  { %v2425_v38 = vadd.f32 %v7206_v18, %v2424_v63  ;;  %v6243_v39 = vpop.f32.mrb[42].mxu1 }
 0x270   :  { %v2529_v41 = vmax.f32 %v2433_v11, 0.0  ;;  %v2436_v12 = vadd.f32 %v6243_v39, %v7206_v18  ;;  %v2427_v42 = vpop.f32.mrb[43].mxu1 }
 0x271   :  { %v2428_v13 = vadd.f32 %v7206_v18, %v2427_v42  ;;  %2598 = vadd.xlane.f32.xlu0 %v2562_v40  ;;  %v2527_v1 = vmax.f32 %v2425_v38, 0.0 }
 0x272   :  { %v2530_v43 = vmax.f32 %v2436_v12, 0.0  ;;  %2600 = vadd.xlane.f32.xlu1 %v2563_v0  ;;  %v2568_v44 = vmul.f32 %v7213_v5, %v2529_v41 }
 0x273   :  { %v2528_v45 = vmax.f32 %v2428_v13, 0.0  ;;  %v2566_v49 = vmul.f32 %v7213_v5, %v2527_v1 }
 0x274   :  { %v2569_v14 = vmul.f32 %v7213_v5, %v2530_v43 }
 0x275   :  { %v6246_v46 = vpop.f32.mrb[44].mxu1  ;;  %2610 = vadd.xlane.f32.xlu0 %v2568_v44  ;;  %v2567_v16 = vmul.f32 %v7213_v5, %v2528_v45 }
 0x276   :  { %v2449_v47 = vadd.f32 %v6246_v46, %v7206_v18  ;;  %v2440_v48 = vpop.f32.mrb[45].mxu1  ;;  %2612 = vadd.xlane.f32.xlu1 %v2569_v14 }
 0x277   :  { %v2441_v15 = vadd.f32 %v7206_v18, %v2440_v48  ;;  %v6247_v2 = vpop.f32.mrb[46].mxu1 }
 0x278   :  { %v2533_v50 = vmax.f32 %v2449_v47, 0.0  ;;  %v2452_v51 = vadd.f32 %v6247_v2, %v7206_v18  ;;  %v2443_v3 = vpop.f32.mrb[47].mxu1 }
 0x279   :  { %v2444_v52 = vadd.f32 %v7206_v18, %v2443_v3  ;;  %2606 = vadd.xlane.f32.xlu0 %v2566_v49  ;;  %v2531_v54 = vmax.f32 %v2441_v15, 0.0 }
 0x27a   :  { %v2534_v53 = vmax.f32 %v2452_v51, 0.0  ;;  %2608 = vadd.xlane.f32.xlu1 %v2567_v16  ;;  %v2572_v17 = vmul.f32 %v7213_v5, %v2533_v50 }
 0x27b   :  { %v2532_v55 = vmax.f32 %v2444_v52, 0.0  ;;  %v2570_v58 = vmul.f32 %v7213_v5, %v2531_v54 }
 0x27c   :  { %v2573_v56 = vmul.f32 %v7213_v5, %v2534_v53 }
 0x27d   :  { %v6250_v19 = vpop.f32.mrb[48].mxu1  ;;  %2618 = vadd.xlane.f32.xlu0 %v2572_v17  ;;  %v2571_v24 = vmul.f32 %v7213_v5, %v2532_v55 }
 0x27e   :  { %v2465_v4 = vadd.f32 %v6250_v19, %v7206_v18  ;;  %v2456_v57 = vpop.f32.mrb[49].mxu1  ;;  %2620 = vadd.xlane.f32.xlu1 %v2573_v56 }
 0x27f   :  { %v2457_v20 = vadd.f32 %v7206_v18, %v2456_v57  ;;  %v6251_v21 = vpop.f32.mrb[50].mxu1 }
 0x280   :  { %v2537_v23 = vmax.f32 %v2465_v4, 0.0  ;;  %v2468_v59 = vadd.f32 %v6251_v21, %v7206_v18  ;;  %v2459_v6 = vpop.f32.mrb[51].mxu1 }
 0x281   :  { %v2460_v25 = vadd.f32 %v7206_v18, %v2459_v6  ;;  %2614 = vadd.xlane.f32.xlu0 %v2570_v58  ;;  %v2535_v27 = vmax.f32 %v2457_v20, 0.0  ;;  %v2720_v58 = vlaneseq }
 0x282   :  { %v2538_v26 = vmax.f32 %v2468_v59, 0.0  ;;  %2616 = vadd.xlane.f32.xlu1 %v2571_v24  ;;  %v2576_v7 = vmul.f32 %v7213_v5, %v2537_v23  ;;  %v7283_v59 = vstv %s8210_s11  ;;  %s6575_s11 = smov [#allocation3]  }
 0x283   :  { %v2536_v28 = vmax.f32 %v2460_v25, 0.0  ;;  %v2574_v9 = vmul.f32 %v7213_v5, %v2535_v27  ;;  %v7278_v23 = vshrl.u32 %v2720_v58, 7  ;;  %s5625_s15 = sshll.u32 %s6575_s11, 4  ;;  %vm5616_vm0 = vcmp.lt.s32.totalorder %v2720_v58, 256  ;;  %s5626_s15 = int_to_ptr.vmem [resolvable:$true] %s5625_s15 }
 0x284   :  { %v2577_v60 = vmul.f32 %v7213_v5, %v2538_v26  ;;  %s6549_s16 = scalar_lea.vmem %s5626_s15, 32  ;;  %p6554_p1 = scmp.lt.s32.totalorder %s5626_s15, %s5626_s15 }
 0x285   :  { %v6254_v29 = vpop.f32.mrb[52].mxu1  ;;  %2626 = vadd.xlane.f32.xlu0 %v2576_v7  ;;  %v2575_v62 = vmul.f32 %v7213_v5, %v2536_v28  ;;  %v7286_v24 = vsub.s32 0, %v7278_v23  ;;  %v7289_v25 = vsub.s32 1, %v7278_v23  ;;  %v7295_v26 = vsub.s32 3, %v7278_v23  ;;  %p6550_p0 = scmp.ne.s32.totalorder %s5626_s15, %s6549_s16  ;;  %p6555_p2 = scmp.lt.s32.totalorder %s6549_s16, %s6549_s16 }
 0x286   :  { %v2481_v30 = vadd.f32 %v6254_v29, %v7206_v18  ;;  %v2472_v8 = vpop.f32.mrb[53].mxu1  ;;  %2628 = vadd.xlane.f32.xlu1 %v2577_v60  ;;  %v7298_v27 = vsub.s32 4, %v7278_v23  ;;  %v7301_v28 = vsub.s32 5, %v7278_v23  ;;  %v7304_v60 = vsub.s32 6, %v7278_v23 }
 0x287   :  { %v2473_v61 = vadd.f32 %v7206_v18, %v2472_v8  ;;  %v6255_v31 = vpop.f32.mrb[54].mxu1  ;;  %v7307_v29 = vsub.s32 7, %v7278_v23  ;;  %p6556_p3 = por %p6555_p2, %p6554_p1 }
 0x288   :  { %v2541_v32 = vmax.f32 %v2481_v30, 0.0  ;;  %v2484_v33 = vadd.f32 %v6255_v31, %v7206_v18  ;;  %v2475_v34 = vpop.f32.mrb[55].mxu1 }
 0x289   :  { %v2476_v10 = vadd.f32 %v7206_v18, %v2475_v34  ;;  %2622 = vadd.xlane.f32.xlu0 %v2574_v9  ;;  %v2539_v37 = vmax.f32 %v2473_v61, 0.0  ;;  %p6557_p4 = pnand %p6556_p3, %p6550_p0 }
 0x28a   :  { %v2542_v35 = vmax.f32 %v2484_v33, 0.0  ;;  %2624 = vadd.xlane.f32.xlu1 %v2575_v62  ;;  %v2580_v36 = vmul.f32 %v7213_v5, %v2541_v32 }
 0x28b   :  { %v2540_v11 = vmax.f32 %v2476_v10, 0.0  ;;  %v2578_v42 = vmul.f32 %v7213_v5, %v2539_v37 }
 0x28c   :  { %v2581_v63 = vmul.f32 %v7213_v5, %v2542_v35 }
 0x28d   :  { %v6258_v38 = vpop.f32.mrb[56].mxu1  ;;  %2634 = vadd.xlane.f32.xlu0 %v2580_v36  ;;  %v2579_v44 = vmul.f32 %v7213_v5, %v2540_v11 }
 0x28e   :  { %v2497_v39 = vadd.f32 %v6258_v38, %v7206_v18  ;;  %v2488_v40 = vpop.f32.mrb[57].mxu1  ;;  %2636 = vadd.xlane.f32.xlu1 %v2581_v63 }
 0x28f   :  { %v2489_v41 = vadd.f32 %v7206_v18, %v2488_v40  ;;  %v6259_v12 = vpop.f32.mrb[58].mxu1 }
 0x290   :  { %v2545_v0 = vmax.f32 %v2497_v39, 0.0  ;;  %v2500_v13 = vadd.f32 %v6259_v12, %v7206_v18  ;;  %v2491_v43 = vpop.f32.mrb[59].mxu1 }
 0x291   :  { %v2492_v1 = vadd.f32 %v7206_v18, %v2491_v43  ;;  %2630 = vadd.xlane.f32.xlu0 %v2578_v42  ;;  %v2543_v46 = vmax.f32 %v2489_v41, 0.0 }
 0x292   :  { %v2546_v45 = vmax.f32 %v2500_v13, 0.0  ;;  %2632 = vadd.xlane.f32.xlu1 %v2579_v44  ;;  %v2584_v14 = vmul.f32 %v7213_v5, %v2545_v0 }
 0x293   :  { %v2544_v47 = vmax.f32 %v2492_v1, 0.0  ;;  %v2582_v3 = vmul.f32 %v7213_v5, %v2543_v46 }
 0x294   :  { %v2585_v48 = vmul.f32 %v7213_v5, %v2546_v45 }
 0x295   :  { %2642 = vadd.xlane.f32.xlu0 %v2584_v14  ;;  %v6262_v15 = vpop.f32.mrb[60].mxu1  ;;  %v2583_v53 = vmul.f32 %v7213_v5, %v2544_v47 }
 0x296   :  { %2644 = vadd.xlane.f32.xlu1 %v2585_v48  ;;  %v2504_v2 = vpop.f32.mrb[61].mxu1  ;;  %v2513_v49 = vadd.f32 %v6262_v15, %v7206_v18 }
 0x297   :  { %v2505_v50 = vadd.f32 %v7206_v18, %v2504_v2  ;;  %v6263_v51 = vpop.f32.mrb[62].mxu1 }
 0x298   :  { %v2516_v16 = vadd.f32 %v6263_v51, %v7206_v18  ;;  %v2507_v52 = vpop.f32.mrb[63].mxu1  ;;  %v2549_v56 = vmax.f32 %v2513_v49, 0.0 }
 0x299   :  { %v2547_v17 = vmax.f32 %v2505_v50, 0.0  ;;  %v2508_v54 = vadd.f32 %v7206_v18, %v2507_v52  ;;  %2638 = vadd.xlane.f32.xlu0 %v2582_v3  ;;  %v3749_v18 = vunpack.c.l.s4 %v6574_v22 }
 0x29a   :  { %v2550_v55 = vmax.f32 %v2516_v16, 0.0  ;;  %2640 = vadd.xlane.f32.xlu1 %v2583_v53  ;;  %v2588_v20 = vmul.f32 %v7213_v5, %v2549_v56 }
 0x29b   :  { %v2586_v19 = vmul.f32 %v7213_v5, %v2547_v17  ;;  %v2548_v4 = vmax.f32 %v2508_v54, 0.0  ;;  %v3750_v6 = vunpack.c.0.s8 %v3749_v18 }
 0x29c   :  { %v2589_v57 = vmul.f32 %v7213_v5, %v2550_v55 }
 0x29d   :  { %2646 = vadd.xlane.f32.xlu0 %v2586_v19  ;;  %v2587_v21 = vmul.f32 %v7213_v5, %v2548_v4  ;;  %v7292_v5 = vsub.s32 2, %v7278_v23  ;;  %v7312_v31 = vsub.s32 %v3750_v6, %v7278_v23 }
 0x29e   :  { %2652 = vadd.xlane.f32.xlu1 %v2589_v57 }
 0x2a1   :  { %2650 = vadd.xlane.f32.xlu0 %v2588_v20 }
 0x2a2   :  { %2648 = vadd.xlane.f32.xlu1 %v2587_v21 }
 0x2f1   :  { %v2595_v7 = vpop.xlane.xlu1 %2594 }
 0x2f2   :  { %v2658_v30 = vadd.f32 %v7283_v59, %v2595_v7  ;;  %v2591_v8 = vpop.xlane.xlu0 %2590 }
 0x2f3   :  { %v2656_v61 = vadd.f32 %v7283_v59, %v2591_v8 }
 0x2f4   :  { %v2787_v9 = vrot.slane %v2658_v30, %v7286_v24  ;;  %v2791_v32 = vrot.slane %v2658_v30, %v7289_v25  ;;  %v2795_v33 = vrot.slane %v2658_v30, %v7292_v5  ;;  %v2799_v34 = vrot.slane %v2658_v30, %v7295_v26 }
 0x2f5   :  { %v2597_v62 = vpop.xlane.xlu1 %2596  ;;  %v2803_v10 = vrot.slane %v2658_v30, %v7298_v27  ;;  %v2807_v35 = vrot.slane %v2658_v30, %v7301_v28  ;;  %v2811_v36 = vrot.slane %v2658_v30, %v7304_v60  ;;  %v2815_v37 = vrot.slane %v2658_v30, %v7307_v29 }
 0x2f6   :  { %v2659_v11 = vadd.f32 %v7283_v59, %v2597_v62  ;;  %v2593_v63 = vpop.xlane.xlu0 %2592  ;;  %v3842_v38 = vcombine.low %v2787_v9, %v2791_v32  ;;  %v3843_v39 = vcombine.low %v2795_v33, %v2799_v34  ;;  %v2723_v40 = vrot.slane %v2656_v61, %v7286_v24 }
 0x2f7   :  { %v7325_v41 = vadd.f32 %v7283_v59, %v2593_v63  ;;  %v3844_v12 = vcombine.low %v2803_v10, %v2807_v35  ;;  %v3845_v42 = vcombine.low %v2811_v36, %v2815_v37  ;;  %v2727_v0 = vrot.slane %v2656_v61, %v7289_v25 }
 0x2f8   :  { %v3852_v13 = vrot.slane %v3842_v38, %v7312_v31  ;;  %v3859_v43 = vrot.slane %v3843_v39, %v7312_v31  ;;  %v2731_v44 = vrot.slane %v2656_v61, %v7292_v5  ;;  %v2735_v1 = vrot.slane %v2656_v61, %v7295_v26 }
 0x2f9   :  { %v3866_v45 = vrot.slane %v3844_v12, %v7312_v31  ;;  %v3873_v14 = vrot.slane %v3845_v42, %v7312_v31  ;;  %v2739_v46 = vrot.slane %v2656_v61, %v7298_v27  ;;  %v2743_v47 = vrot.slane %v2656_v61, %v7301_v28 }
 0x2fa   :  { %v2603_v48 = vpop.xlane.xlu0 %2602  ;;  %v3874_v15 = vcombine.low %v3852_v13, %v3859_v43  ;;  %v2747_v2 = vrot.slane %v2656_v61, %v7304_v60  ;;  %v2751_v49 = vrot.slane %v2656_v61, %v7307_v29  ;;  %v3744_v50 = vcombine.low %v2723_v40, %v2727_v0 }
 0x2fb   :  { %v7339_v51 = vadd.f32 %v7283_v59, %v2603_v48  ;;  %v2605_v3 = vpop.xlane.xlu1 %2604  ;;  %v3875_v16 = vcombine.low %v3866_v45, %v3873_v14  ;;  %v3745_v52 = vcombine.low %v2731_v44, %v2735_v1  ;;  %v3746_v53 = vcombine.low %v2739_v46, %v2743_v47 }
 0x2fc   :  { %v7342_v17 = vadd.f32 %v7283_v59, %v2605_v3  ;;  %v3882_v54 = vrot.slane %v3874_v15, %v7312_v31  ;;  %v3747_v55 = vcombine.low %v2747_v2, %v2751_v49  ;;  %v3754_v56 = vrot.slane %v3744_v50, %v7312_v31 }
 0x2fd   :  { %v3889_v19 = vrot.slane %v3875_v16, %v7312_v31  ;;  %v3761_v4 = vrot.slane %v3745_v52, %v7312_v31  ;;  %v3768_v57 = vrot.slane %v3746_v53, %v7312_v31  ;;  %v2819_v20 = vrot.slane %v2659_v11, %v7286_v24 }
 0x2fe   :  { %v2599_v21 = vpop.xlane.xlu0 %2598  ;;  %v3775_v22 = vrot.slane %v3747_v55, %v7312_v31  ;;  %v2823_v18 = vrot.slane %v2659_v11, %v7289_v25  ;;  %v2827_v6 = vrot.slane %v2659_v11, %v7292_v5  ;;  %v2831_v7 = vrot.slane %v2659_v11, %v7295_v26 }
 0x2ff   :  { %v7355_v30 = vadd.f32 %v7283_v59, %v2599_v21  ;;  %v2601_v8 = vpop.xlane.xlu1 %2600  ;;  %v3890_v61 = vcombine.low %v3882_v54, %v3889_v19  ;;  %v3776_v9 = vcombine.low %v3754_v56, %v3761_v4  ;;  %v2835_v32 = vrot.slane %v2659_v11, %v7298_v27 }
 0x300   :  { %v7359_v33 = vadd.f32 %v7283_v59, %v2601_v8  ;;  %v3777_v34 = vcombine.low %v3768_v57, %v3775_v22  ;;  %v2839_v62 = vrot.slane %v2659_v11, %v7301_v28  ;;  %v2843_v10 = vrot.slane %v2659_v11, %v7304_v60 }
 0x301   :  { %5319 = vperm.xlu1 %6431, %v3890_v61   ;;  %v3784_v35 = vrot.slane %v3776_v9, %v7312_v31  ;;  %v2847_v36 = vrot.slane %v2659_v11, %v7307_v29  ;;  %v3891_v37 = vcombine.low %v2819_v20, %v2823_v18  ;;  %v3892_v63 = vcombine.low %v2827_v6, %v2831_v7 }
 0x302   :  { %v3791_v38 = vrot.slane %v3777_v34, %v7312_v31  ;;  %v2611_v39 = vpop.xlane.xlu0 %2610  ;;  %v3893_v40 = vcombine.low %v2835_v32, %v2839_v62  ;;  %v2755_v12 = vrot.slane %v7325_v41, %v7286_v24  ;;  %v2759_v42 = vrot.slane %v7325_v41, %v7289_v25 }
 0x303   :  { %v7371_v0 = vadd.f32 %v7283_v59, %v2611_v39  ;;  %v2613_v13 = vpop.xlane.xlu1 %2612  ;;  %v3894_v43 = vcombine.low %v2843_v10, %v2847_v36  ;;  %v3901_v44 = vrot.slane %v3891_v37, %v7312_v31  ;;  %v3908_v11 = vrot.slane %v3892_v63, %v7312_v31 }
 0x304   :  { %v3792_v1 = vcombine.low %v3784_v35, %v3791_v38  ;;  %v7376_v45 = vadd.f32 %v7283_v59, %v2613_v13  ;;  %v3915_v14 = vrot.slane %v3893_v40, %v7312_v31  ;;  %v2763_v46 = vrot.slane %v7325_v41, %v7292_v5 }
 0x305   :  { %v3922_v47 = vrot.slane %v3894_v43, %v7312_v31  ;;  %v3923_v48 = vcombine.low %v3901_v44, %v3908_v11  ;;  %v2767_v15 = vrot.slane %v7325_v41, %v7295_v26  ;;  %v2771_v2 = vrot.slane %v7325_v41, %v7298_v27 }
 0x306   :  { %5313 = vperm.xlu0 %6432, %v3792_v1   ;;  %v2607_v49 = vpop.xlane.xlu0 %2606  ;;  %v2775_v50 = vrot.slane %v7325_v41, %v7301_v28  ;;  %v2779_v3 = vrot.slane %v7325_v41, %v7304_v60  ;;  %v2783_v16 = vrot.slane %v7325_v41, %v7307_v29  ;;  %v3793_v52 = vcombine.low %v2755_v12, %v2759_v42 }
 0x307   :  { %v3924_v53 = vcombine.low %v3915_v14, %v3922_v47  ;;  %v3931_v54 = vrot.slane %v3923_v48, %v7312_v31  ;;  %v7394_v55 = vadd.f32 %v7283_v59, %v2607_v49  ;;  %v2609_v56 = vpop.xlane.xlu1 %2608  ;;  %v3794_v19 = vcombine.low %v2763_v46, %v2767_v15 }
 0x308   :  { %v7397_v4 = vadd.f32 %v7283_v59, %v2609_v56  ;;  %v3795_v57 = vcombine.low %v2771_v2, %v2775_v50  ;;  %v3796_v20 = vcombine.low %v2779_v3, %v2783_v16  ;;  %v3803_v21 = vrot.slane %v3793_v52, %v7312_v31 }
 0x309   :  { %v3938_v22 = vrot.slane %v3924_v53, %v7312_v31  ;;  %v3810_v41 = vrot.slane %v3794_v19, %v7312_v31  ;;  %v2915_v18 = vrot.slane %v7339_v51, %v7286_v24  ;;  %v2919_v6 = vrot.slane %v7339_v51, %v7289_v25 }
 0x30a   :  { %v3817_v7 = vrot.slane %v3795_v57, %v7312_v31  ;;  %v3824_v8 = vrot.slane %v3796_v20, %v7312_v31  ;;  %v2619_v61 = vpop.xlane.xlu0 %2618  ;;  %v2923_v9 = vrot.slane %v7339_v51, %v7292_v5  ;;  %v2927_v32 = vrot.slane %v7339_v51, %v7295_v26 }
 0x30b   :  { %v3939_v34 = vcombine.low %v3931_v54, %v3938_v22  ;;  %v3825_v62 = vcombine.low %v3803_v21, %v3810_v41  ;;  %v7413_v10 = vadd.f32 %v7283_v59, %v2619_v61  ;;  %v2621_v35 = vpop.xlane.xlu1 %2620  ;;  %v2931_v36 = vrot.slane %v7339_v51, %v7298_v27 }
 0x30c   :  { %v3826_v37 = vcombine.low %v3817_v7, %v3824_v8  ;;  %v7418_v63 = vadd.f32 %v7283_v59, %v2621_v35  ;;  %v2935_v38 = vrot.slane %v7339_v51, %v7301_v28  ;;  %v2939_v39 = vrot.slane %v7339_v51, %v7304_v60 }
 0x30d   :  { %5322 = vperm.xlu1 %6431, %v3939_v34   ;;  %v3833_v40 = vrot.slane %v3825_v62, %v7312_v31  ;;  %v2943_v12 = vrot.slane %v7339_v51, %v7307_v29  ;;  %v4038_v42 = vcombine.low %v2915_v18, %v2919_v6  ;;  %v4039_v13 = vcombine.low %v2923_v9, %v2927_v32 }
 0x30e   :  { %v3840_v43 = vrot.slane %v3826_v37, %v7312_v31  ;;  %v4040_v44 = vcombine.low %v2931_v36, %v2935_v38  ;;  %v2615_v11 = vpop.xlane.xlu0 %2614  ;;  %v2851_v1 = vrot.slane %v7355_v30, %v7286_v24  ;;  %v2855_v14 = vrot.slane %v7355_v30, %v7289_v25 }
 0x30f   :  { %v4041_v46 = vcombine.low %v2939_v39, %v2943_v12  ;;  %v4048_v47 = vrot.slane %v4038_v42, %v7312_v31  ;;  %v4055_v48 = vrot.slane %v4039_v13, %v7312_v31  ;;  %v7435_v15 = vadd.f32 %v7283_v59, %v2615_v11  ;;  %v2617_v51 = vpop.xlane.xlu1 %2616 }
 0x310   :  { %v3841_v2 = vcombine.low %v3833_v40, %v3840_v43  ;;  %v4062_v49 = vrot.slane %v4040_v44, %v7312_v31  ;;  %v7439_v50 = vadd.f32 %v7283_v59, %v2617_v51  ;;  %v2859_v3 = vrot.slane %v7355_v30, %v7292_v5 }
 0x311   :  { %v4069_v16 = vrot.slane %v4041_v46, %v7312_v31  ;;  %v4070_v52 = vcombine.low %v4048_v47, %v4055_v48  ;;  %v2863_v53 = vrot.slane %v7355_v30, %v7295_v26  ;;  %v2867_v54 = vrot.slane %v7355_v30, %v7298_v27 }
 0x312   :  { %5316 = vperm.xlu1 %6431, %v3841_v2   ;;  %v2871_v56 = vrot.slane %v7355_v30, %v7301_v28  ;;  %v2875_v19 = vrot.slane %v7355_v30, %v7304_v60  ;;  %v2879_v57 = vrot.slane %v7355_v30, %v7307_v29  ;;  %v3940_v20 = vcombine.low %v2851_v1, %v2855_v14  ;;  %v2627_v21 = vpop.xlane.xlu0 %2626 }
 0x313   :  { %v4071_v22 = vcombine.low %v4062_v49, %v4069_v16  ;;  %v4078_v41 = vrot.slane %v4070_v52, %v7312_v31  ;;  %v3941_v18 = vcombine.low %v2859_v3, %v2863_v53  ;;  %v7456_v6 = vadd.f32 %v7283_v59, %v2627_v21  ;;  %v2629_v7 = vpop.xlane.xlu1 %2628 }
 0x314   :  { %v3942_v8 = vcombine.low %v2867_v54, %v2871_v56  ;;  %v3943_v61 = vcombine.low %v2875_v19, %v2879_v57  ;;  %v3950_v9 = vrot.slane %v3940_v20, %v7312_v31  ;;  %v7460_v32 = vadd.f32 %v7283_v59, %v2629_v7 }
 0x315   :  { %v4085_v34 = vrot.slane %v4071_v22, %v7312_v31  ;;  %v3957_v30 = vrot.slane %v3941_v18, %v7312_v31  ;;  %v2947_v62 = vrot.slane %v7342_v17, %v7286_v24  ;;  %v2951_v35 = vrot.slane %v7342_v17, %v7289_v25 }
 0x316   :  { %v3964_v36 = vrot.slane %v3942_v8, %v7312_v31  ;;  %v3971_v37 = vrot.slane %v3943_v61, %v7312_v31  ;;  %v2955_v38 = vrot.slane %v7342_v17, %v7292_v5  ;;  %v2959_v39 = vrot.slane %v7342_v17, %v7295_v26  ;;  %v2623_v40 = vpop.xlane.xlu0 %2622 }
 0x317   :  { %v4086_v12 = vcombine.low %v4078_v41, %v4085_v34  ;;  %v3972_v42 = vcombine.low %v3950_v9, %v3957_v30  ;;  %v2963_v13 = vrot.slane %v7342_v17, %v7298_v27  ;;  %v2967_v43 = vrot.slane %v7342_v17, %v7301_v28  ;;  %v2625_v56 = vpop.xlane.xlu1 %2624 }
 0x318   :  { %v3973_v44 = vcombine.low %v3964_v36, %v3971_v37  ;;  %v2971_v11 = vrot.slane %v7342_v17, %v7304_v60  ;;  %v2975_v1 = vrot.slane %v7342_v17, %v7307_v29  ;;  %v4087_v14 = vcombine.low %v2947_v62, %v2951_v35 }
 0x319   :  { %5331 = vperm.xlu1 %6431, %v4086_v12   ;;  %v3980_v46 = vrot.slane %v3972_v42, %v7312_v31  ;;  %v4088_v47 = vcombine.low %v2955_v38, %v2959_v39  ;;  %v4089_v48 = vcombine.low %v2963_v13, %v2967_v43  ;;  %v7484_v51 = vadd.f32 %v7283_v59, %v2623_v40 }
 0x31a   :  { %v3987_v2 = vrot.slane %v3973_v44, %v7312_v31  ;;  %v4090_v49 = vcombine.low %v2971_v11, %v2975_v1  ;;  %v4097_v3 = vrot.slane %v4087_v14, %v7312_v31  ;;  %v3011_v16 = vrot.slane %v7397_v4, %v7286_v24  ;;  %v2635_v43 = vpop.xlane.xlu0 %2634 }
 0x31b   :  { %v4104_v52 = vrot.slane %v4088_v47, %v7312_v31  ;;  %v4111_v17 = vrot.slane %v4089_v48, %v7312_v31  ;;  %v3015_v53 = vrot.slane %v7397_v4, %v7289_v25  ;;  %v3019_v54 = vrot.slane %v7397_v4, %v7292_v5  ;;  %v2637_v44 = vpop.xlane.xlu1 %2636 }
 0x31c   :  { %v3988_v19 = vcombine.low %v3980_v46, %v3987_v2  ;;  %v4118_v57 = vrot.slane %v4090_v49, %v7312_v31  ;;  %v3023_v20 = vrot.slane %v7397_v4, %v7295_v26  ;;  %v3027_v21 = vrot.slane %v7397_v4, %v7298_v27 }
 0x31d   :  { %v4119_v22 = vcombine.low %v4097_v3, %v4104_v52  ;;  %v3031_v41 = vrot.slane %v7397_v4, %v7301_v28  ;;  %v3035_v18 = vrot.slane %v7397_v4, %v7304_v60  ;;  %v3039_v7 = vrot.slane %v7397_v4, %v7307_v29 }
 0x31e   :  { %5325 = vperm.xlu1 %6431, %v3988_v19   ;;  %v4120_v8 = vcombine.low %v4111_v17, %v4118_v57  ;;  %v4185_v61 = vcombine.low %v3011_v16, %v3015_v53  ;;  %v4186_v9 = vcombine.low %v3019_v54, %v3023_v20  ;;  %v7508_v34 = vadd.f32 %v7283_v59, %v2625_v56 }
 0x31f   :  { %v4127_v30 = vrot.slane %v4119_v22, %v7312_v31  ;;  %v4187_v62 = vcombine.low %v3027_v21, %v3031_v41  ;;  %v4188_v35 = vcombine.low %v3035_v18, %v3039_v7  ;;  %v2883_v36 = vrot.slane %v7359_v33, %v7286_v24 }
 0x320   :  { %v4134_v37 = vrot.slane %v4120_v8, %v7312_v31  ;;  %v4195_v38 = vrot.slane %v4185_v61, %v7312_v31  ;;  %v4202_v4 = vrot.slane %v4186_v9, %v7312_v31  ;;  %v2887_v39 = vrot.slane %v7359_v33, %v7289_v25  ;;  %v2631_v8 = vpop.xlane.xlu0 %2630  ;;  %v2633_v61 = vpop.xlane.xlu1 %2632 }
 0x321   :  { %v4209_v40 = vrot.slane %v4187_v62, %v7312_v31  ;;  %v4216_v12 = vrot.slane %v4188_v35, %v7312_v31  ;;  %v2891_v42 = vrot.slane %v7359_v33, %v7292_v5  ;;  %v2895_v13 = vrot.slane %v7359_v33, %v7295_v26 }
 0x322   :  { %v4135_v11 = vcombine.low %v4127_v30, %v4134_v37  ;;  %v4217_v1 = vcombine.low %v4195_v38, %v4202_v4  ;;  %v2899_v14 = vrot.slane %v7359_v33, %v7298_v27  ;;  %v2903_v46 = vrot.slane %v7359_v33, %v7301_v28 }
 0x323   :  { %v4218_v47 = vcombine.low %v4209_v40, %v4216_v12  ;;  %v2907_v48 = vrot.slane %v7359_v33, %v7304_v60  ;;  %v2911_v2 = vrot.slane %v7359_v33, %v7307_v29  ;;  %v3989_v49 = vcombine.low %v2883_v36, %v2887_v39 }
 0x324   :  { %5334 = vperm.xlu1 %6431, %v4135_v11   ;;  %v4225_v3 = vrot.slane %v4217_v1, %v7312_v31  ;;  %v3990_v16 = vcombine.low %v2891_v42, %v2895_v13  ;;  %v3991_v52 = vcombine.low %v2899_v14, %v2903_v46  ;;  %v7534_v17 = vadd.f32 %v7283_v59, %v2635_v43 }
 0x325   :  { %v4232_v53 = vrot.slane %v4218_v47, %v7312_v31  ;;  %v3992_v54 = vcombine.low %v2907_v48, %v2911_v2  ;;  %v3999_v56 = vrot.slane %v3989_v49, %v7312_v31  ;;  %v7539_v19 = vadd.f32 %v7283_v59, %v2637_v44 }
 0x326   :  { %v4006_v57 = vrot.slane %v3990_v16, %v7312_v31  ;;  %v4013_v33 = vrot.slane %v3991_v52, %v7312_v31  ;;  %v3043_v20 = vrot.slane %v7371_v0, %v7286_v24  ;;  %v3047_v21 = vrot.slane %v7371_v0, %v7289_v25 }
 0x327   :  { %v4233_v22 = vcombine.low %v4225_v3, %v4232_v53  ;;  %v4020_v41 = vrot.slane %v3992_v54, %v7312_v31  ;;  %v3051_v18 = vrot.slane %v7371_v0, %v7292_v5  ;;  %v3055_v7 = vrot.slane %v7371_v0, %v7295_v26  ;;  %v2643_v3 = vpop.xlane.xlu0 %2642 }
 0x328   :  { %v4021_v9 = vcombine.low %v3999_v56, %v4006_v57  ;;  %v3059_v30 = vrot.slane %v7371_v0, %v7298_v27  ;;  %v3063_v62 = vrot.slane %v7371_v0, %v7301_v28  ;;  %v3067_v35 = vrot.slane %v7371_v0, %v7304_v60 }
 0x329   :  { %5340 = vperm.xlu0 %6432, %v4233_v22   ;;  %v4022_v36 = vcombine.low %v4013_v33, %v4020_v41  ;;  %v3071_v37 = vrot.slane %v7371_v0, %v7307_v29  ;;  %v4234_v38 = vcombine.low %v3043_v20, %v3047_v21  ;;  %v4235_v4 = vcombine.low %v3051_v18, %v3055_v7 }
 0x32a   :  { %v4029_v39 = vrot.slane %v4021_v9, %v7312_v31  ;;  %v4236_v40 = vcombine.low %v3059_v30, %v3063_v62  ;;  %v7562_v12 = vadd.f32 %v7283_v59, %v2631_v8  ;;  %v7565_v42 = vadd.f32 %v7283_v59, %v2633_v61 }
 0x32b   :  { %v4036_v13 = vrot.slane %v4022_v36, %v7312_v31  ;;  %v4237_v43 = vcombine.low %v3067_v35, %v3071_v37  ;;  %v4244_v44 = vrot.slane %v4234_v38, %v7312_v31  ;;  %v4251_v11 = vrot.slane %v4235_v4, %v7312_v31  ;;  %v2645_v36 = vpop.xlane.xlu1 %2644 }
 0x32c   :  { %v4258_v0 = vrot.slane %v4236_v40, %v7312_v31  ;;  %v2979_v1 = vrot.slane %v7394_v55, %v7286_v24  ;;  %v2983_v14 = vrot.slane %v7394_v55, %v7289_v25  ;;  %v2987_v46 = vrot.slane %v7394_v55, %v7292_v5 }
 0x32d   :  { %v4037_v47 = vcombine.low %v4029_v39, %v4036_v13  ;;  %v4265_v48 = vrot.slane %v4237_v43, %v7312_v31  ;;  %v4266_v2 = vcombine.low %v4244_v44, %v4251_v11  ;;  %v2991_v49 = vrot.slane %v7394_v55, %v7295_v26 }
 0x32e   :  { %v2995_v16 = vrot.slane %v7394_v55, %v7298_v27  ;;  %v2999_v52 = vrot.slane %v7394_v55, %v7301_v28  ;;  %v3003_v53 = vrot.slane %v7394_v55, %v7304_v60  ;;  %v3007_v54 = vrot.slane %v7394_v55, %v7307_v29 }
 0x32f   :  { %5328 = vperm.xlu1 %6431, %v4037_v47   ;;  %v4267_v56 = vcombine.low %v4258_v0, %v4265_v48  ;;  %v4274_v57 = vrot.slane %v4266_v2, %v7312_v31  ;;  %v4136_v33 = vcombine.low %v2979_v1, %v2983_v14  ;;  %v4137_v20 = vcombine.low %v2987_v46, %v2991_v49 }
 0x330   :  { %v4138_v21 = vcombine.low %v2995_v16, %v2999_v52  ;;  %v4139_v22 = vcombine.low %v3003_v53, %v3007_v54  ;;  %v7590_v41 = vadd.f32 %v7283_v59, %v2643_v3  ;;  %v3331_v18 = vrot.slane %v7460_v32, %v7286_v24  ;;  %v2639_v52 = vpop.xlane.xlu0 %2638 }
 0x331   :  { %v4281_v7 = vrot.slane %v4267_v56, %v7312_v31  ;;  %v4146_v8 = vrot.slane %v4136_v33, %v7312_v31  ;;  %v4153_v55 = vrot.slane %v4137_v20, %v7312_v31  ;;  %v3335_v61 = vrot.slane %v7460_v32, %v7289_v25 }
 0x332   :  { %v4160_v9 = vrot.slane %v4138_v21, %v7312_v31  ;;  %v4167_v30 = vrot.slane %v4139_v22, %v7312_v31  ;;  %v3339_v62 = vrot.slane %v7460_v32, %v7292_v5  ;;  %v3343_v35 = vrot.slane %v7460_v32, %v7295_v26 }
 0x333   :  { %v4282_v37 = vcombine.low %v4274_v57, %v4281_v7  ;;  %v4168_v38 = vcombine.low %v4146_v8, %v4153_v55  ;;  %v3347_v4 = vrot.slane %v7460_v32, %v7298_v27  ;;  %v3351_v39 = vrot.slane %v7460_v32, %v7301_v28 }
 0x334   :  { %v4169_v40 = vcombine.low %v4160_v9, %v4167_v30  ;;  %v3355_v13 = vrot.slane %v7460_v32, %v7304_v60  ;;  %v3359_v43 = vrot.slane %v7460_v32, %v7307_v29  ;;  %v4675_v44 = vcombine.low %v3331_v18, %v3335_v61 }
 0x335   :  { %5343 = vperm.xlu1 %6431, %v4282_v37   ;;  %v4176_v11 = vrot.slane %v4168_v38, %v7312_v31  ;;  %v4676_v0 = vcombine.low %v3339_v62, %v3343_v35  ;;  %v4677_v1 = vcombine.low %v3347_v4, %v3351_v39  ;;  %v7615_v14 = vadd.f32 %v7283_v59, %v2645_v36 }
 0x336   :  { %v4183_v46 = vrot.slane %v4169_v40, %v7312_v31  ;;  %v4678_v47 = vcombine.low %v3355_v13, %v3359_v43  ;;  %v4685_v48 = vrot.slane %v4675_v44, %v7312_v31  ;;  %v3075_v2 = vrot.slane %v7376_v45, %v7286_v24  ;;  %v2641_v13 = vpop.xlane.xlu1 %2640 }
 0x337   :  { %v4692_v49 = vrot.slane %v4676_v0, %v7312_v31  ;;  %v4699_v32 = vrot.slane %v4677_v1, %v7312_v31  ;;  %v3079_v3 = vrot.slane %v7376_v45, %v7289_v25  ;;  %v3083_v16 = vrot.slane %v7376_v45, %v7292_v5 }
 0x338   :  { %v4184_v53 = vcombine.low %v4176_v11, %v4183_v46  ;;  %v4706_v54 = vrot.slane %v4678_v47, %v7312_v31  ;;  %v3087_v56 = vrot.slane %v7376_v45, %v7295_v26  ;;  %v3091_v57 = vrot.slane %v7376_v45, %v7298_v27 }
 0x339   :  { %v4707_v33 = vcombine.low %v4685_v48, %v4692_v49  ;;  %v3095_v20 = vrot.slane %v7376_v45, %v7301_v28  ;;  %v3099_v21 = vrot.slane %v7376_v45, %v7304_v60  ;;  %v3103_v22 = vrot.slane %v7376_v45, %v7307_v29 }
 0x33a   :  { %5337 = vperm.xlu1 %6431, %v4184_v53   ;;  %v4708_v18 = vcombine.low %v4699_v32, %v4706_v54  ;;  %v4283_v7 = vcombine.low %v3075_v2, %v3079_v3  ;;  %v4284_v8 = vcombine.low %v3083_v16, %v3087_v56  ;;  %v7639_v55 = vadd.f32 %v7283_v59, %v2639_v52 }
 0x33b   :  { %v4715_v61 = vrot.slane %v4707_v33, %v7312_v31  ;;  %v4285_v9 = vcombine.low %v3091_v57, %v3095_v20  ;;  %v4286_v30 = vcombine.low %v3099_v21, %v3103_v22  ;;  %v3267_v62 = vrot.slane %v7508_v34, %v7286_v24 }
 0x33c   :  { %v4722_v35 = vrot.slane %v4708_v18, %v7312_v31  ;;  %v4293_v36 = vrot.slane %v4283_v7, %v7312_v31  ;;  %v4300_v45 = vrot.slane %v4284_v8, %v7312_v31  ;;  %v3271_v37 = vrot.slane %v7508_v34, %v7289_v25 }
 0x33d   :  { %v4307_v38 = vrot.slane %v4285_v9, %v7312_v31  ;;  %v4314_v4 = vrot.slane %v4286_v30, %v7312_v31  ;;  %v3275_v39 = vrot.slane %v7508_v34, %v7292_v5  ;;  %v3279_v40 = vrot.slane %v7508_v34, %v7295_v26 }
 0x33e   :  { %v4723_v43 = vcombine.low %v4715_v61, %v4722_v35  ;;  %v4315_v44 = vcombine.low %v4293_v36, %v4300_v45  ;;  %v3283_v11 = vrot.slane %v7508_v34, %v7298_v27  ;;  %v3287_v0 = vrot.slane %v7508_v34, %v7301_v28 }
 0x33f   :  { %v4316_v1 = vcombine.low %v4307_v38, %v4314_v4  ;;  %v3291_v46 = vrot.slane %v7508_v34, %v7304_v60  ;;  %v3295_v47 = vrot.slane %v7508_v34, %v7307_v29  ;;  %v4577_v48 = vcombine.low %v3267_v62, %v3271_v37 }
 0x340   :  { %5370 = vperm.xlu0 %6432, %v4723_v43   ;;  %v4323_v2 = vrot.slane %v4315_v44, %v7312_v31  ;;  %v4578_v49 = vcombine.low %v3275_v39, %v3279_v40  ;;  %v4579_v32 = vcombine.low %v3283_v11, %v3287_v0  ;;  %v7665_v3 = vadd.f32 %v7283_v59, %v2641_v13 }
 0x341   :  { %v4330_v16 = vrot.slane %v4316_v1, %v7312_v31  ;;  %v4580_v52 = vcombine.low %v3291_v46, %v3295_v47  ;;  %v4587_v53 = vrot.slane %v4577_v48, %v7312_v31  ;;  %v3107_v54 = vrot.slane %v7435_v15, %v7286_v24  ;;  %v2647_v1 = vpop.xlane.xlu0 %2646  ;;  %v2653_v46 = vpop.xlane.xlu1 %2652 }
 0x342   :  { %v4594_v56 = vrot.slane %v4578_v49, %v7312_v31  ;;  %v4601_v34 = vrot.slane %v4579_v32, %v7312_v31  ;;  %v3111_v57 = vrot.slane %v7435_v15, %v7289_v25  ;;  %v3115_v33 = vrot.slane %v7435_v15, %v7292_v5 }
 0x343   :  { %v4331_v20 = vcombine.low %v4323_v2, %v4330_v16  ;;  %v4608_v21 = vrot.slane %v4580_v52, %v7312_v31  ;;  %v3119_v22 = vrot.slane %v7435_v15, %v7295_v26  ;;  %v3123_v18 = vrot.slane %v7435_v15, %v7298_v27 }
 0x344   :  { %v4609_v7 = vcombine.low %v4587_v53, %v4594_v56  ;;  %v3127_v8 = vrot.slane %v7435_v15, %v7301_v28  ;;  %v3131_v61 = vrot.slane %v7435_v15, %v7304_v60  ;;  %v3135_v9 = vrot.slane %v7435_v15, %v7307_v29 }
 0x345   :  { %5346 = vperm.xlu1 %6431, %v4331_v20   ;;  %v4610_v30 = vcombine.low %v4601_v34, %v4608_v21  ;;  %v4332_v62 = vcombine.low %v3107_v54, %v3111_v57  ;;  %v4333_v35 = vcombine.low %v3115_v33, %v3119_v22  ;;  %v3459_v36 = vrot.slane %v7539_v19, %v7286_v24 }
 0x346   :  { %v4617_v45 = vrot.slane %v4609_v7, %v7312_v31  ;;  %v4334_v37 = vcombine.low %v3123_v18, %v3127_v8  ;;  %v4335_v38 = vcombine.low %v3131_v61, %v3135_v9  ;;  %v3463_v4 = vrot.slane %v7539_v19, %v7289_v25 }
 0x347   :  { %v4624_v39 = vrot.slane %v4610_v30, %v7312_v31  ;;  %v4342_v40 = vrot.slane %v4332_v62, %v7312_v31  ;;  %v4349_v15 = vrot.slane %v4333_v35, %v7312_v31  ;;  %v3467_v13 = vrot.slane %v7539_v19, %v7292_v5 }
 0x348   :  { %v4356_v43 = vrot.slane %v4334_v37, %v7312_v31  ;;  %v4363_v44 = vrot.slane %v4335_v38, %v7312_v31  ;;  %v3471_v11 = vrot.slane %v7539_v19, %v7295_v26  ;;  %v3475_v0 = vrot.slane %v7539_v19, %v7298_v27 }
 0x349   :  { %v4625_v47 = vcombine.low %v4617_v45, %v4624_v39  ;;  %v4364_v48 = vcombine.low %v4342_v40, %v4349_v15  ;;  %v3479_v2 = vrot.slane %v7539_v19, %v7301_v28  ;;  %v3483_v49 = vrot.slane %v7539_v19, %v7304_v60 }
 0x34a   :  { %v4365_v32 = vcombine.low %v4356_v43, %v4363_v44  ;;  %v3487_v16 = vrot.slane %v7539_v19, %v7307_v29  ;;  %v4871_v52 = vcombine.low %v3459_v36, %v3463_v4  ;;  %v4872_v53 = vcombine.low %v3467_v13, %v3471_v11 }
 0x34b   :  { %5364 = vperm.xlu0 %6432, %v4625_v47   ;;  %v4372_v54 = vrot.slane %v4364_v48, %v7312_v31  ;;  %v4873_v56 = vcombine.low %v3475_v0, %v3479_v2  ;;  %v7712_v34 = vadd.f32 %v7283_v59, %v2647_v1  ;;  %v7715_v57 = vadd.f32 %v7283_v59, %v2653_v46 }
 0x34c   :  { %v4379_v33 = vrot.slane %v4365_v32, %v7312_v31  ;;  %v4874_v20 = vcombine.low %v3483_v49, %v3487_v16  ;;  %v4881_v21 = vrot.slane %v4871_v52, %v7312_v31  ;;  %v4888_v22 = vrot.slane %v4872_v53, %v7312_v31  ;;  %v2651_v49 = vpop.xlane.xlu0 %2650  ;;  %v2649_v32 = vpop.xlane.xlu1 %2648 }
 0x34d   :  { %v4895_v19 = vrot.slane %v4873_v56, %v7312_v31  ;;  %v3139_v18 = vrot.slane %v7439_v50, %v7286_v24  ;;  %v3143_v7 = vrot.slane %v7439_v50, %v7289_v25  ;;  %v3147_v8 = vrot.slane %v7439_v50, %v7292_v5 }
 0x34e   :  { %v4380_v61 = vcombine.low %v4372_v54, %v4379_v33  ;;  %v4902_v9 = vrot.slane %v4874_v20, %v7312_v31  ;;  %v4903_v30 = vcombine.low %v4881_v21, %v4888_v22  ;;  %v3151_v62 = vrot.slane %v7439_v50, %v7295_v26 }
 0x34f   :  { %v3155_v35 = vrot.slane %v7439_v50, %v7298_v27  ;;  %v3159_v36 = vrot.slane %v7439_v50, %v7301_v28  ;;  %v3163_v45 = vrot.slane %v7439_v50, %v7304_v60  ;;  %v3167_v37 = vrot.slane %v7439_v50, %v7307_v29 }
 0x350   :  { %5349 = vperm.xlu1 %6431, %v4380_v61   ;;  %v4904_v38 = vcombine.low %v4895_v19, %v4902_v9  ;;  %v4911_v4 = vrot.slane %v4903_v30, %v7312_v31  ;;  %v4381_v39 = vcombine.low %v3139_v18, %v3143_v7  ;;  %v4382_v40 = vcombine.low %v3147_v8, %v3151_v62 }
 0x351   :  { %v4383_v15 = vcombine.low %v3155_v35, %v3159_v36  ;;  %v4384_v13 = vcombine.low %v3163_v45, %v3167_v37  ;;  %v3395_v43 = vrot.slane %v7565_v42, %v7286_v24  ;;  %v3399_v44 = vrot.slane %v7565_v42, %v7289_v25 }
 0x352   :  { %v4918_v11 = vrot.slane %v4904_v38, %v7312_v31  ;;  %v4391_v0 = vrot.slane %v4381_v39, %v7312_v31  ;;  %v4398_v50 = vrot.slane %v4382_v40, %v7312_v31  ;;  %v3403_v1 = vrot.slane %v7565_v42, %v7292_v5 }
 0x353   :  { %v4405_v46 = vrot.slane %v4383_v15, %v7312_v31  ;;  %v4412_v47 = vrot.slane %v4384_v13, %v7312_v31  ;;  %v3407_v48 = vrot.slane %v7565_v42, %v7295_v26  ;;  %v3411_v2 = vrot.slane %v7565_v42, %v7298_v27 }
 0x354   :  { %v4919_v16 = vcombine.low %v4911_v4, %v4918_v11  ;;  %v4413_v52 = vcombine.low %v4391_v0, %v4398_v50  ;;  %v3415_v53 = vrot.slane %v7565_v42, %v7301_v28  ;;  %v3419_v54 = vrot.slane %v7565_v42, %v7304_v60 }
 0x355   :  { %v4414_v56 = vcombine.low %v4405_v46, %v4412_v47  ;;  %v3423_v33 = vrot.slane %v7565_v42, %v7307_v29  ;;  %v4773_v20 = vcombine.low %v3395_v43, %v3399_v44  ;;  %v4774_v21 = vcombine.low %v3403_v1, %v3407_v48 }
 0x356   :  { %5382 = vperm.xlu0 %6432, %v4919_v16   ;;  %v4421_v22 = vrot.slane %v4413_v52, %v7312_v31  ;;  %v4775_v19 = vcombine.low %v3411_v2, %v3415_v53  ;;  %v7762_v18 = vadd.f32 %v7283_v59, %v2651_v49  ;;  %v7765_v7 = vadd.f32 %v7283_v59, %v2649_v32 }
 0x357   :  { %v4428_v8 = vrot.slane %v4414_v56, %v7312_v31  ;;  %v4776_v61 = vcombine.low %v3419_v54, %v3423_v33  ;;  %v4783_v9 = vrot.slane %v4773_v20, %v7312_v31  ;;  %v4790_v30 = vrot.slane %v4774_v21, %v7312_v31 }
 0x358   :  { %v4797_v42 = vrot.slane %v4775_v19, %v7312_v31  ;;  %v3299_v62 = vrot.slane %v7456_v6, %v7286_v24  ;;  %v3303_v35 = vrot.slane %v7456_v6, %v7289_v25  ;;  %v3307_v36 = vrot.slane %v7456_v6, %v7292_v5 }
 0x359   :  { %v4429_v59 = vcombine.low %v4421_v22, %v4428_v8  ;;  %v4804_v45 = vrot.slane %v4776_v61, %v7312_v31  ;;  %v4805_v37 = vcombine.low %v4783_v9, %v4790_v30  ;;  %v3311_v38 = vrot.slane %v7456_v6, %v7295_v26 }
 0x35a   :  { %v3315_v4 = vrot.slane %v7456_v6, %v7298_v27  ;;  %v3319_v39 = vrot.slane %v7456_v6, %v7301_v28  ;;  %v3323_v40 = vrot.slane %v7456_v6, %v7304_v60  ;;  %v3327_v15 = vrot.slane %v7456_v6, %v7307_v29 }
 0x35b   :  { %5352 = vperm.xlu1 %6431, %v4429_v59   ;;  %v4806_v13 = vcombine.low %v4797_v42, %v4804_v45  ;;  %v4813_v43 = vrot.slane %v4805_v37, %v7312_v31  ;;  %v4626_v44 = vcombine.low %v3299_v62, %v3303_v35  ;;  %v4627_v11 = vcombine.low %v3307_v36, %v3311_v38 }
 0x35c   :  { %v4628_v0 = vcombine.low %v3315_v4, %v3319_v39  ;;  %v4629_v50 = vcombine.low %v3323_v40, %v3327_v15  ;;  %v3555_v1 = vrot.slane %v7590_v41, %v7286_v24  ;;  %v3559_v46 = vrot.slane %v7590_v41, %v7289_v25 }
 0x35d   :  { %v4820_v47 = vrot.slane %v4806_v13, %v7312_v31  ;;  %v4636_v48 = vrot.slane %v4626_v44, %v7312_v31  ;;  %v4643_v6 = vrot.slane %v4627_v11, %v7312_v31  ;;  %v3563_v2 = vrot.slane %v7590_v41, %v7292_v5 }
 0x35e   :  { %v4650_v49 = vrot.slane %v4628_v0, %v7312_v31  ;;  %v4657_v32 = vrot.slane %v4629_v50, %v7312_v31  ;;  %v3567_v16 = vrot.slane %v7590_v41, %v7295_v26  ;;  %v3571_v52 = vrot.slane %v7590_v41, %v7298_v27 }
 0x35f   :  { %v4821_v53 = vcombine.low %v4813_v43, %v4820_v47  ;;  %v4658_v54 = vcombine.low %v4636_v48, %v4643_v6  ;;  %v3575_v56 = vrot.slane %v7590_v41, %v7301_v28  ;;  %v3579_v33 = vrot.slane %v7590_v41, %v7304_v60 }
 0x360   :  { %v4659_v20 = vcombine.low %v4650_v49, %v4657_v32  ;;  %v3583_v21 = vrot.slane %v7590_v41, %v7307_v29  ;;  %v5018_v22 = vcombine.low %v3555_v1, %v3559_v46  ;;  %v5019_v19 = vcombine.low %v3563_v2, %v3567_v16 }
 0x361   :  { %5376 = vperm.xlu0 %6432, %v4821_v53   ;;  %v4666_v8 = vrot.slane %v4658_v54, %v7312_v31  ;;  %v5020_v61 = vcombine.low %v3571_v52, %v3575_v56  ;;  %v3235_v9 = vrot.slane %v7484_v51, %v7286_v24  ;;  %v3239_v30 = vrot.slane %v7484_v51, %v7289_v25 }
 0x362   :  { %v4673_v42 = vrot.slane %v4659_v20, %v7312_v31  ;;  %v5021_v62 = vcombine.low %v3579_v33, %v3583_v21  ;;  %v5028_v35 = vrot.slane %v5018_v22, %v7312_v31  ;;  %v5035_v36 = vrot.slane %v5019_v19, %v7312_v31 }
 0x363   :  { %v5042_v41 = vrot.slane %v5020_v61, %v7312_v31  ;;  %v3243_v59 = vrot.slane %v7484_v51, %v7292_v5  ;;  %v3247_v45 = vrot.slane %v7484_v51, %v7295_v26  ;;  %v3251_v37 = vrot.slane %v7484_v51, %v7298_v27 }
 0x364   :  { %v4674_v38 = vcombine.low %v4666_v8, %v4673_v42  ;;  %v5049_v4 = vrot.slane %v5021_v62, %v7312_v31  ;;  %v5050_v39 = vcombine.low %v5028_v35, %v5035_v36  ;;  %v3255_v40 = vrot.slane %v7484_v51, %v7301_v28 }
 0x365   :  { %v3259_v15 = vrot.slane %v7484_v51, %v7304_v60  ;;  %v3263_v13 = vrot.slane %v7484_v51, %v7307_v29  ;;  %v4528_v43 = vcombine.low %v3235_v9, %v3239_v30  ;;  %v4529_v44 = vcombine.low %v3243_v59, %v3247_v45 }
 0x366   :  { %5367 = vperm.xlu1 %6431, %v4674_v38   ;;  %v5051_v11 = vcombine.low %v5042_v41, %v5049_v4  ;;  %v5058_v0 = vrot.slane %v5050_v39, %v7312_v31  ;;  %v4530_v50 = vcombine.low %v3251_v37, %v3255_v40  ;;  %v3587_v1 = vrot.slane %v7615_v14, %v7286_v24 }
 0x367   :  { %v4531_v46 = vcombine.low %v3259_v15, %v3263_v13  ;;  %v4538_v47 = vrot.slane %v4528_v43, %v7312_v31  ;;  %v4545_v48 = vrot.slane %v4529_v44, %v7312_v31  ;;  %v3591_v6 = vrot.slane %v7615_v14, %v7289_v25 }
 0x368   :  { %v5065_v51 = vrot.slane %v5051_v11, %v7312_v31  ;;  %v4552_v2 = vrot.slane %v4530_v50, %v7312_v31  ;;  %v3595_v49 = vrot.slane %v7615_v14, %v7292_v5  ;;  %v3599_v32 = vrot.slane %v7615_v14, %v7295_v26 }
 0x369   :  { %v4559_v16 = vrot.slane %v4531_v46, %v7312_v31  ;;  %v4560_v52 = vcombine.low %v4538_v47, %v4545_v48  ;;  %v3603_v53 = vrot.slane %v7615_v14, %v7298_v27  ;;  %v3607_v54 = vrot.slane %v7615_v14, %v7301_v28 }
 0x36a   :  { %v5066_v56 = vcombine.low %v5058_v0, %v5065_v51  ;;  %v3611_v33 = vrot.slane %v7615_v14, %v7304_v60  ;;  %v3615_v20 = vrot.slane %v7615_v14, %v7307_v29  ;;  %v5067_v21 = vcombine.low %v3587_v1, %v3591_v6 }
 0x36b   :  { %v4561_v22 = vcombine.low %v4552_v2, %v4559_v16  ;;  %v4568_v19 = vrot.slane %v4560_v52, %v7312_v31  ;;  %v5068_v8 = vcombine.low %v3595_v49, %v3599_v32  ;;  %v5069_v61 = vcombine.low %v3603_v53, %v3607_v54 }
 0x36c   :  { %5391 = vperm.xlu0 %6432, %v5066_v56   ;;  %v5070_v9 = vcombine.low %v3611_v33, %v3615_v20  ;;  %v5077_v30 = vrot.slane %v5067_v21, %v7312_v31  ;;  %v3427_v42 = vrot.slane %v7534_v17, %v7286_v24  ;;  %v3431_v62 = vrot.slane %v7534_v17, %v7289_v25 }
 0x36d   :  { %v4575_v35 = vrot.slane %v4561_v22, %v7312_v31  ;;  %v5084_v14 = vrot.slane %v5068_v8, %v7312_v31  ;;  %v5091_v36 = vrot.slane %v5069_v61, %v7312_v31  ;;  %v3435_v41 = vrot.slane %v7534_v17, %v7292_v5 }
 0x36e   :  { %v5098_v59 = vrot.slane %v5070_v9, %v7312_v31  ;;  %v3439_v45 = vrot.slane %v7534_v17, %v7295_v26  ;;  %v3443_v37 = vrot.slane %v7534_v17, %v7298_v27  ;;  %v3447_v38 = vrot.slane %v7534_v17, %v7301_v28 }
 0x36f   :  { %v4576_v4 = vcombine.low %v4568_v19, %v4575_v35  ;;  %v5099_v39 = vcombine.low %v5077_v30, %v5084_v14  ;;  %v3451_v40 = vrot.slane %v7534_v17, %v7304_v60  ;;  %v3455_v15 = vrot.slane %v7534_v17, %v7307_v29 }
 0x370   :  { %v5100_v13 = vcombine.low %v5091_v36, %v5098_v59  ;;  %v4822_v43 = vcombine.low %v3427_v42, %v3431_v62  ;;  %v4823_v44 = vcombine.low %v3435_v41, %v3439_v45  ;;  %v4824_v11 = vcombine.low %v3443_v37, %v3447_v38 }
 0x371   :  { %5361 = vperm.xlu1 %6431, %v4576_v4   ;;  %v5107_v0 = vrot.slane %v5099_v39, %v7312_v31  ;;  %v4825_v50 = vcombine.low %v3451_v40, %v3455_v15  ;;  %v3523_v1 = vrot.slane %v7665_v3, %v7286_v24  ;;  %v3527_v46 = vrot.slane %v7665_v3, %v7289_v25 }
 0x372   :  { %v5114_v47 = vrot.slane %v5100_v13, %v7312_v31  ;;  %v4832_v48 = vrot.slane %v4822_v43, %v7312_v31  ;;  %v4839_v17 = vrot.slane %v4823_v44, %v7312_v31  ;;  %v4846_v6 = vrot.slane %v4824_v11, %v7312_v31 }
 0x373   :  { %v4853_v51 = vrot.slane %v4825_v50, %v7312_v31  ;;  %v3531_v2 = vrot.slane %v7665_v3, %v7292_v5  ;;  %v3535_v49 = vrot.slane %v7665_v3, %v7295_v26  ;;  %v3539_v32 = vrot.slane %v7665_v3, %v7298_v27 }
 0x374   :  { %v5115_v16 = vcombine.low %v5107_v0, %v5114_v47  ;;  %v4854_v52 = vcombine.low %v4832_v48, %v4839_v17  ;;  %v3543_v53 = vrot.slane %v7665_v3, %v7301_v28  ;;  %v3547_v54 = vrot.slane %v7665_v3, %v7304_v60 }
 0x375   :  { %v4855_v56 = vcombine.low %v4846_v6, %v4853_v51  ;;  %v3551_v33 = vrot.slane %v7665_v3, %v7307_v29  ;;  %v4969_v20 = vcombine.low %v3523_v1, %v3527_v46  ;;  %v4970_v21 = vcombine.low %v3531_v2, %v3535_v49 }
 0x376   :  { %5394 = vperm.xlu0 %6432, %v5115_v16   ;;  %v4862_v22 = vrot.slane %v4854_v52, %v7312_v31  ;;  %v4971_v19 = vcombine.low %v3539_v32, %v3543_v53  ;;  %v3363_v8 = vrot.slane %v7562_v12, %v7286_v24  ;;  %v3367_v61 = vrot.slane %v7562_v12, %v7289_v25 }
 0x377   :  { %v4869_v9 = vrot.slane %v4855_v56, %v7312_v31  ;;  %v4972_v30 = vcombine.low %v3547_v54, %v3551_v33  ;;  %v4979_v42 = vrot.slane %v4969_v20, %v7312_v31  ;;  %v4986_v62 = vrot.slane %v4970_v21, %v7312_v31 }
 0x378   :  { %v4993_v3 = vrot.slane %v4971_v19, %v7312_v31  ;;  %v3371_v35 = vrot.slane %v7562_v12, %v7292_v5  ;;  %v3375_v14 = vrot.slane %v7562_v12, %v7295_v26  ;;  %v3379_v36 = vrot.slane %v7562_v12, %v7298_v27 }
 0x379   :  { %v4870_v41 = vcombine.low %v4862_v22, %v4869_v9  ;;  %v5000_v59 = vrot.slane %v4972_v30, %v7312_v31  ;;  %v5001_v45 = vcombine.low %v4979_v42, %v4986_v62  ;;  %v3383_v37 = vrot.slane %v7562_v12, %v7301_v28 }
 0x37a   :  { %v3387_v38 = vrot.slane %v7562_v12, %v7304_v60  ;;  %v3391_v4 = vrot.slane %v7562_v12, %v7307_v29  ;;  %v4724_v39 = vcombine.low %v3363_v8, %v3367_v61  ;;  %v4725_v40 = vcombine.low %v3371_v35, %v3375_v14 }
 0x37b   :  { %5379 = vperm.xlu1 %6431, %v4870_v41   ;;  %v5002_v15 = vcombine.low %v4993_v3, %v5000_v59  ;;  %v5009_v13 = vrot.slane %v5001_v45, %v7312_v31  ;;  %v4726_v43 = vcombine.low %v3379_v36, %v3383_v37  ;;  %v3683_v44 = vrot.slane %v7762_v18, %v7286_v24 }
 0x37c   :  { %v4727_v11 = vcombine.low %v3387_v38, %v3391_v4  ;;  %v4734_v0 = vrot.slane %v4724_v39, %v7312_v31  ;;  %v4741_v50 = vrot.slane %v4725_v40, %v7312_v31  ;;  %v3687_v1 = vrot.slane %v7762_v18, %v7289_v25 }
 0x37d   :  { %v5016_v12 = vrot.slane %v5002_v15, %v7312_v31  ;;  %v4748_v46 = vrot.slane %v4726_v43, %v7312_v31  ;;  %v3691_v47 = vrot.slane %v7762_v18, %v7292_v5  ;;  %v3695_v48 = vrot.slane %v7762_v18, %v7295_v26 }
 0x37e   :  { %v4755_v17 = vrot.slane %v4727_v11, %v7312_v31  ;;  %v4756_v6 = vcombine.low %v4734_v0, %v4741_v50  ;;  %v3699_v51 = vrot.slane %v7762_v18, %v7298_v27  ;;  %v3703_v2 = vrot.slane %v7762_v18, %v7301_v28 }
 0x37f   :  { %v5017_v49 = vcombine.low %v5009_v13, %v5016_v12  ;;  %v3707_v32 = vrot.slane %v7762_v18, %v7304_v60  ;;  %v3711_v16 = vrot.slane %v7762_v18, %v7307_v29  ;;  %v5214_v52 = vcombine.low %v3683_v44, %v3687_v1 }
 0x380   :  { %v4757_v53 = vcombine.low %v4748_v46, %v4755_v17  ;;  %v4764_v54 = vrot.slane %v4756_v6, %v7312_v31  ;;  %v5215_v56 = vcombine.low %v3691_v47, %v3695_v48  ;;  %v5216_v33 = vcombine.low %v3699_v51, %v3703_v2 }
 0x381   :  { %5388 = vperm.xlu0 %6432, %v5017_v49   ;;  %v5217_v20 = vcombine.low %v3707_v32, %v3711_v16  ;;  %v5224_v21 = vrot.slane %v5214_v52, %v7312_v31  ;;  %v3491_v22 = vrot.slane %v7639_v55, %v7286_v24  ;;  %v3495_v19 = vrot.slane %v7639_v55, %v7289_v25 }
 0x382   :  { %v4771_v8 = vrot.slane %v4757_v53, %v7312_v31  ;;  %v5231_v18 = vrot.slane %v5215_v56, %v7312_v31  ;;  %v5238_v61 = vrot.slane %v5216_v33, %v7312_v31  ;;  %v3499_v9 = vrot.slane %v7639_v55, %v7292_v5 }
 0x383   :  { %v5245_v30 = vrot.slane %v5217_v20, %v7312_v31  ;;  %v3503_v42 = vrot.slane %v7639_v55, %v7295_v26  ;;  %v3507_v62 = vrot.slane %v7639_v55, %v7298_v27  ;;  %v3511_v3 = vrot.slane %v7639_v55, %v7301_v28 }
 0x384   :  { %v4772_v35 = vcombine.low %v4764_v54, %v4771_v8  ;;  %v5246_v14 = vcombine.low %v5224_v21, %v5231_v18  ;;  %v3515_v36 = vrot.slane %v7639_v55, %v7304_v60  ;;  %v3519_v41 = vrot.slane %v7639_v55, %v7307_v29 }
 0x385   :  { %v5247_v59 = vcombine.low %v5238_v61, %v5245_v30  ;;  %v4920_v45 = vcombine.low %v3491_v22, %v3495_v19  ;;  %v4921_v37 = vcombine.low %v3499_v9, %v3503_v42  ;;  %v4922_v38 = vcombine.low %v3507_v62, %v3511_v3 }
 0x386   :  { %5373 = vperm.xlu1 %6431, %v4772_v35   ;;  %v5254_v4 = vrot.slane %v5246_v14, %v7312_v31  ;;  %v4923_v39 = vcombine.low %v3515_v36, %v3519_v41  ;;  %v3619_v40 = vrot.slane %v7712_v34, %v7286_v24  ;;  %v3623_v15 = vrot.slane %v7712_v34, %v7289_v25 }
 0x387   :  { %v5261_v13 = vrot.slane %v5247_v59, %v7312_v31  ;;  %v4930_v43 = vrot.slane %v4920_v45, %v7312_v31  ;;  %v4937_v55 = vrot.slane %v4921_v37, %v7312_v31  ;;  %v4944_v44 = vrot.slane %v4922_v38, %v7312_v31 }
 0x388   :  { %v4951_v11 = vrot.slane %v4923_v39, %v7312_v31  ;;  %v3627_v0 = vrot.slane %v7712_v34, %v7292_v5  ;;  %v3631_v50 = vrot.slane %v7712_v34, %v7295_v26  ;;  %v3635_v1 = vrot.slane %v7712_v34, %v7298_v27 }
 0x389   :  { %v5262_v12 = vcombine.low %v5254_v4, %v5261_v13  ;;  %v4952_v46 = vcombine.low %v4930_v43, %v4937_v55  ;;  %v3639_v47 = vrot.slane %v7712_v34, %v7301_v28  ;;  %v3643_v48 = vrot.slane %v7712_v34, %v7304_v60 }
 0x38a   :  { %v4953_v17 = vcombine.low %v4944_v44, %v4951_v11  ;;  %v3647_v6 = vrot.slane %v7712_v34, %v7307_v29  ;;  %v5116_v51 = vcombine.low %v3619_v40, %v3623_v15  ;;  %v5117_v2 = vcombine.low %v3627_v0, %v3631_v50 }
 0x38b   :  { %5403 = vperm.xlu0 %6432, %v5262_v12   ;;  %v4960_v49 = vrot.slane %v4952_v46, %v7312_v31  ;;  %v5118_v32 = vcombine.low %v3635_v1, %v3639_v47  ;;  %v3171_v16 = vrot.slane %v7413_v10, %v7286_v24  ;;  %v3175_v52 = vrot.slane %v7413_v10, %v7289_v25 }
 0x38c   :  { %v4967_v53 = vrot.slane %v4953_v17, %v7312_v31  ;;  %v5119_v54 = vcombine.low %v3643_v48, %v3647_v6  ;;  %v5126_v56 = vrot.slane %v5116_v51, %v7312_v31  ;;  %v5133_v33 = vrot.slane %v5117_v2, %v7312_v31 }
 0x38d   :  { %v5140_v34 = vrot.slane %v5118_v32, %v7312_v31  ;;  %v3179_v20 = vrot.slane %v7413_v10, %v7292_v5  ;;  %v3183_v21 = vrot.slane %v7413_v10, %v7295_v26  ;;  %v3187_v22 = vrot.slane %v7413_v10, %v7298_v27 }
 0x38e   :  { %v4968_v19 = vcombine.low %v4960_v49, %v4967_v53  ;;  %v5147_v8 = vrot.slane %v5119_v54, %v7312_v31  ;;  %v5148_v18 = vcombine.low %v5126_v56, %v5133_v33  ;;  %v3191_v61 = vrot.slane %v7413_v10, %v7301_v28 }
 0x38f   :  { %v3195_v9 = vrot.slane %v7413_v10, %v7304_v60  ;;  %v3199_v30 = vrot.slane %v7413_v10, %v7307_v29  ;;  %v4430_v42 = vcombine.low %v3171_v16, %v3175_v52  ;;  %v4431_v62 = vcombine.low %v3179_v20, %v3183_v21 }
 0x390   :  { %5385 = vperm.xlu1 %6431, %v4968_v19   ;;  %v5149_v3 = vcombine.low %v5140_v34, %v5147_v8  ;;  %v5156_v35 = vrot.slane %v5148_v18, %v7312_v31  ;;  %v4432_v14 = vcombine.low %v3187_v22, %v3191_v61  ;;  %v3651_v36 = vrot.slane %v7765_v7, %v7286_v24 }
 0x391   :  { %v4433_v41 = vcombine.low %v3195_v9, %v3199_v30  ;;  %v4440_v59 = vrot.slane %v4430_v42, %v7312_v31  ;;  %v4447_v45 = vrot.slane %v4431_v62, %v7312_v31  ;;  %v3655_v37 = vrot.slane %v7765_v7, %v7289_v25 }
 0x392   :  { %v5163_v10 = vrot.slane %v5149_v3, %v7312_v31  ;;  %v4454_v38 = vrot.slane %v4432_v14, %v7312_v31  ;;  %v3659_v4 = vrot.slane %v7765_v7, %v7292_v5  ;;  %v3663_v39 = vrot.slane %v7765_v7, %v7295_v26 }
 0x393   :  { %v4461_v40 = vrot.slane %v4433_v41, %v7312_v31  ;;  %v4462_v15 = vcombine.low %v4440_v59, %v4447_v45  ;;  %v3667_v13 = vrot.slane %v7765_v7, %v7298_v27  ;;  %v3671_v43 = vrot.slane %v7765_v7, %v7301_v28 }
 0x394   :  { %v5164_v55 = vcombine.low %v5156_v35, %v5163_v10  ;;  %v3675_v44 = vrot.slane %v7765_v7, %v7304_v60  ;;  %v3679_v11 = vrot.slane %v7765_v7, %v7307_v29  ;;  %v5165_v0 = vcombine.low %v3651_v36, %v3655_v37 }
 0x395   :  { %v4463_v50 = vcombine.low %v4454_v38, %v4461_v40  ;;  %v4470_v1 = vrot.slane %v4462_v15, %v7312_v31  ;;  %v5166_v12 = vcombine.low %v3659_v4, %v3663_v39  ;;  %v5167_v46 = vcombine.low %v3667_v13, %v3671_v43 }
 0x396   :  { %5397 = vperm.xlu0 %6432, %v5164_v55   ;;  %v5168_v47 = vcombine.low %v3675_v44, %v3679_v11  ;;  %v5175_v48 = vrot.slane %v5165_v0, %v7312_v31  ;;  %v3203_v17 = vrot.slane %v7418_v63, %v7286_v24  ;;  %v3207_v6 = vrot.slane %v7418_v63, %v7289_v25  ;;  %v8082_v44 = vpop.permute.xlu1 %5319 }
 0x397   :  { %v4477_v51 = vrot.slane %v4463_v50, %v7312_v31  ;;  %v5182_v7 = vrot.slane %v5166_v12, %v7312_v31  ;;  %v5189_v2 = vrot.slane %v5167_v46, %v7312_v31  ;;  %v3211_v49 = vrot.slane %v7418_v63, %v7292_v5 }
 0x398   :  { %v5196_v32 = vrot.slane %v5168_v47, %v7312_v31  ;;  %v3215_v16 = vrot.slane %v7418_v63, %v7295_v26  ;;  %v3219_v52 = vrot.slane %v7418_v63, %v7298_v27  ;;  %v3223_v53 = vrot.slane %v7418_v63, %v7301_v28 }
 0x399   :  { %v4478_v54 = vcombine.low %v4470_v1, %v4477_v51  ;;  %v5197_v56 = vcombine.low %v5175_v48, %v5182_v7  ;;  %v3227_v33 = vrot.slane %v7418_v63, %v7304_v60  ;;  %v3231_v34 = vrot.slane %v7418_v63, %v7307_v29 }
 0x39a   :  { %v5198_v20 = vcombine.low %v5189_v2, %v5196_v32  ;;  %v4479_v21 = vcombine.low %v3203_v17, %v3207_v6  ;;  %v4480_v22 = vcombine.low %v3211_v49, %v3215_v16  ;;  %v4481_v19 = vcombine.low %v3219_v52, %v3223_v53  ;;  %v8084_v11 = vpop.permute.xlu1 %5322  ;;  %v5314_v6 = vpop.permute.xlu0 %5313 }
 0x39b   :  { %5355 = vperm.xlu1 %6431, %v4478_v54   ;;  %v5205_v8 = vrot.slane %v5197_v56, %v7312_v31  ;;  %v4482_v18 = vcombine.low %v3227_v33, %v3231_v34  ;;  %v3715_v61 = vrot.slane %v7715_v57, %v7286_v24  ;;  %v3719_v9 = vrot.slane %v7715_v57, %v7289_v25 }
 0x39c   :  { %v5212_v30 = vrot.slane %v5198_v20, %v7312_v31  ;;  %v4489_v42 = vrot.slane %v4479_v21, %v7312_v31  ;;  %v4496_v63 = vrot.slane %v4480_v22, %v7312_v31  ;;  %v4503_v62 = vrot.slane %v4481_v19, %v7312_v31 }
 0x39d   :  { %v4510_v3 = vrot.slane %v4482_v18, %v7312_v31  ;;  %v3723_v35 = vrot.slane %v7715_v57, %v7292_v5  ;;  %v3727_v14 = vrot.slane %v7715_v57, %v7295_v26  ;;  %v3731_v24 = vrot.slane %v7715_v57, %v7298_v27 }
 0x39e   :  { %v5213_v25 = vcombine.low %v5205_v8, %v5212_v30  ;;  %v4511_v36 = vcombine.low %v4489_v42, %v4496_v63  ;;  %v3735_v41 = vrot.slane %v7715_v57, %v7301_v28  ;;  %v3739_v59 = vrot.slane %v7715_v57, %v7304_v60  ;;  %v5317_v0 = vpop.permute.xlu1 %5316 }
 0x39f   :  { %v4512_v45 = vcombine.low %v4503_v62, %v4510_v3  ;;  %v3743_v37 = vrot.slane %v7715_v57, %v7307_v29  ;;  %v5263_v10 = vcombine.low %v3715_v61, %v3719_v9  ;;  %v5264_v5 = vcombine.low %v3723_v35, %v3727_v14 }
 0x3a0   :  { %5400 = vperm.xlu0 %6432, %v5213_v25   ;;  %v4519_v26 = vrot.slane %v4511_v36, %v7312_v31  ;;  %v5265_v38 = vcombine.low %v3731_v24, %v3735_v41  ;;  %v8107_v54 = vand.u32 127, %v2720_v58 }
 0x3a1   :  { %v4526_v27 = vrot.slane %v4512_v45, %v7312_v31  ;;  %v5266_v4 = vcombine.low %v3739_v59, %v3743_v37  ;;  %v5273_v39 = vrot.slane %v5263_v10, %v7312_v31  ;;  %v5280_v28 = vrot.slane %v5264_v5, %v7312_v31 }
 0x3a2   :  { %v5287_v40 = vrot.slane %v5265_v38, %v7312_v31  ;;  %v8086_v50 = vpop.permute.xlu1 %5331  ;;  %v5414_v33 = vadd.s32 4294967288, %v8107_v54  ;;  %v5412_v34 = vsub.s32 %v8107_v54, %v7278_v23  ;;  %v5421_v21 = vadd.s32 4294967280, %v8107_v54 }
 0x3a3   :  { %v4527_v60 = vcombine.low %v4519_v26, %v4526_v27  ;;  %v5294_v15 = vrot.slane %v5266_v4, %v7312_v31  ;;  %v5295_v13 = vcombine.low %v5273_v39, %v5280_v28  ;;  %v5435_v8 = vadd.s32 4294967264, %v8107_v54 }
 0x3a4   :  { %v5417_v22 = vsub.s32 %v5414_v33, %v7278_v23  ;;  %v5428_v61 = vadd.s32 4294967272, %v8107_v54  ;;  %v5424_v30 = vsub.s32 %v5421_v21, %v7278_v23  ;;  %v5442_v14 = vadd.s32 4294967256, %v8107_v54 }
 0x3a5   :  { %5358 = vperm.xlu1 %6431, %v4527_v60   ;;  %v5296_v29 = vcombine.low %v5287_v40, %v5294_v15  ;;  %v5303_v57 = vrot.slane %v5295_v13, %v7312_v31  ;;  %v5438_v62 = vsub.s32 %v5435_v8, %v7278_v23  ;;  %v5449_v59 = vadd.s32 4294967248, %v8107_v54 }
 0x3a6   :  { %v8088_v1 = vpop.permute.xlu1 %5325  ;;  %v5431_v35 = vsub.s32 %v5428_v61, %v7278_v23  ;;  %v5418_v45 = vrot.slane %v5317_v0, %v5417_v22  ;;  %v5445_v37 = vsub.s32 %v5442_v14, %v7278_v23  ;;  %v5413_v26 = vrot.slane %v5314_v6, %v5412_v34 }
 0x3a7   :  { %v5310_v43 = vrot.slane %v5296_v29, %v7312_v31  ;;  %v5456_v38 = vadd.s32 4294967240, %v8107_v54  ;;  %v5452_v4 = vsub.s32 %v5449_v59, %v7278_v23  ;;  %v5463_v39 = vadd.s32 4294967232, %v8107_v54 }
 0x3a8   :  { %v8100_v51 = vpop.permute.xlu0 %5340  ;;  %v5420_v40 = vsel %vm5419_vm1, %v5418_v45, %v5413_v26  ;;  %v5425_v15 = vrot.slane %v8082_v44, %v5424_v30  ;;  %v5498_v14 = vadd.s32 4294967192, %v8107_v54  ;;  %v5512_v59 = vadd.s32 4294967176, %v8107_v54 }
 0x3a9   :  { %v5311_v55 = vcombine.low %v5303_v57, %v5310_v43  ;;  %v5459_v29 = vsub.s32 %v5456_v38, %v7278_v23  ;;  %v5466_v0 = vsub.s32 %v5463_v39, %v7278_v23  ;;  %v5505_v45 = vadd.s32 4294967184, %v8107_v54 }
 0x3aa   :  { %v8090_v12 = vpop.permute.xlu1 %5334  ;;  %v5427_v43 = vsel %vm5426_vm2, %v5425_v15, %v5420_v40 }
 0x3ab   :  { %5406 = vperm.xlu0 %6432, %v5311_v55   ;;  %v5439_v55 = vrot.slane %v8088_v1, %v5438_v62 }
 0x3ae   :  { %v8092_v46 = vpop.permute.xlu1 %5328 }
 0x3b4   :  { %v8094_v47 = vpop.permute.xlu1 %5343 }
 0x3b9   :  { %v8096_v48 = vpop.permute.xlu1 %5337 }
 0x3bf   :  { %v5371_v2 = vpop.permute.xlu0 %5370 }
 0x3c0   :  { %v5536_v41 = vrot.slane %v5371_v2, %v5431_v35  ;;  %v5432_v2 = vrot.slane %v8084_v11, %v5431_v35 }
 0x3c2   :  { %v5434_v33 = vsel %vm5433_vm3, %v5432_v2, %v5427_v43 }
 0x3c3   :  { %v5441_v1 = vsel %vm5440_vm4, %v5439_v55, %v5434_v33 }
 0x3c4   :  { %v8098_v17 = vpop.permute.xlu1 %5346 }
 0x3ca   :  { %v5365_v32 = vpop.permute.xlu0 %5364 }
 0x3cb   :  { %v5526_v9 = vrot.slane %v5365_v32, %v5417_v22  ;;  %v5470_v32 = vadd.s32 4294967224, %v8107_v54  ;;  %v5484_v22 = vadd.s32 4294967208, %v8107_v54 }
 0x3cd   :  { %v5473_v21 = vsub.s32 %v5470_v32, %v7278_v23  ;;  %v5487_v35 = vsub.s32 %v5484_v22, %v7278_v23 }
 0x3cf   :  { %v8102_v7 = vpop.permute.xlu1 %5349 }
 0x3d5   :  { %v5383_v52 = vpop.permute.xlu0 %5382 }
 0x3d6   :  { %v5556_v44 = vrot.slane %v5383_v52, %v5459_v29 }
 0x3da   :  { %v8104_v49 = vpop.permute.xlu1 %5352 }
 0x3e0   :  { %v5377_v56 = vpop.permute.xlu0 %5376 }
 0x3e1   :  { %v5546_v27 = vrot.slane %v5377_v56, %v5445_v37 }
 0x3e5   :  { %v5368_v16 = vpop.permute.xlu1 %5367 }
 0x3e6   :  { %v5531_v3 = vrot.slane %v5368_v16, %v5424_v30  ;;  %v5446_v16 = vrot.slane %v8092_v46, %v5445_v37  ;;  %v5453_v46 = vrot.slane %v8086_v50, %v5452_v4 }
 0x3e8   :  { %v5448_v11 = vsel %vm5447_vm5, %v5446_v16, %v5441_v1 }
 0x3e9   :  { %v5455_v8 = vsel %vm5454_vm6, %v5453_v46, %v5448_v11 }
 0x3eb   :  { %v8115_v18 = vpop.permute.xlu0 %5391 }
 0x3f0   :  { %v5362_v53 = vpop.permute.xlu1 %5361 }
 0x3f1   :  { %v5522_v19 = vrot.slane %v5362_v53, %v5412_v34 }
 0x3f3   :  { %v5527_v42 = vsel %vm5419_vm1, %v5526_v9, %v5522_v19  ;;  %v5467_v9 = vrot.slane %v8096_v48, %v5466_v0 }
 0x3f4   :  { %v5532_v24 = vsel %vm5426_vm2, %v5531_v3, %v5527_v42  ;;  %v5460_v42 = vrot.slane %v8090_v12, %v5459_v29  ;;  %v5474_v12 = vrot.slane %v8100_v51, %v5473_v21  ;;  %v5488_v51 = vrot.slane %v8098_v17, %v5487_v35 }
 0x3f5   :  { %v8124_v25 = vpop.permute.xlu0 %5394  ;;  %v5537_v10 = vsel %vm5433_vm3, %v5536_v41, %v5532_v24 }
 0x3f6   :  { %v5462_v3 = vsel %vm5461_vm7, %v5460_v42, %v5455_v8  ;;  %v5576_v41 = vrot.slane %v8124_v25, %v5487_v35 }
 0x3f7   :  { %v5469_v24 = vsel %vm5468_vm8, %v5467_v9, %v5462_v3 }
 0x3fa   :  { %v5380_v20 = vpop.permute.xlu1 %5379 }
 0x3fb   :  { %v5551_v13 = vrot.slane %v5380_v20, %v5452_v4  ;;  %v5477_v20 = vadd.s32 4294967216, %v8107_v54  ;;  %v5515_v4 = vsub.s32 %v5512_v59, %v7278_v23 }
 0x3fd   :  { %v5480_v61 = vsub.s32 %v5477_v20, %v7278_v23 }
 0x3ff   :  { %v5571_v50 = vrot.slane %v8115_v18, %v5480_v61  ;;  %v5481_v38 = vrot.slane %v8094_v47, %v5480_v61 }
 0x400   :  { %v5389_v28 = vpop.permute.xlu0 %5388 }
 0x401   :  { %v5566_v19 = vrot.slane %v5389_v28, %v5473_v21  ;;  %v5508_v28 = vsub.s32 %v5505_v45, %v7278_v23 }
 0x405   :  { %v5374_v63 = vpop.permute.xlu1 %5373 }
 0x406   :  { %v5541_v36 = vrot.slane %v5374_v63, %v5438_v62  ;;  %v5491_v62 = vadd.s32 4294967200, %v8107_v54 }
 0x408   :  { %v5542_v5 = vsel %vm5440_vm4, %v5541_v36, %v5537_v10  ;;  %v5494_v18 = vsub.s32 %v5491_v62, %v7278_v23  ;;  %v5476_v10 = vsel %vm5475_vm9, %v5474_v12, %v5469_v24 }
 0x409   :  { %v5547_v60 = vsel %vm5447_vm5, %v5546_v27, %v5542_v5  ;;  %v5501_v5 = vsub.s32 %v5498_v14, %v7278_v23  ;;  %v5483_v39 = vsel %vm5482_vm10, %v5481_v38, %v5476_v10 }
 0x40a   :  { %v5552_v6 = vsel %vm5454_vm6, %v5551_v13, %v5547_v60  ;;  %v8144_v53 = vpop.permute.xlu0 %5403  ;;  %v5495_v54 = vrot.slane %v8102_v7, %v5494_v18  ;;  %v5490_v47 = vsel %vm5489_vm11, %v5488_v51, %v5483_v39 }
 0x40b   :  { %v5557_v34 = vsel %vm5461_vm7, %v5556_v44, %v5552_v6  ;;  %v5502_v15 = vrot.slane %v8104_v49, %v5501_v5  ;;  %v5591_v43 = vrot.slane %v8144_v53, %v5508_v28 }
 0x40f   :  { %v5386_v57 = vpop.permute.xlu1 %5385 }
 0x410   :  { %v5561_v56 = vrot.slane %v5386_v57, %v5466_v0  ;;  %v5497_v57 = vsel %vm5496_vm12, %v5495_v54, %v5490_v47 }
 0x411   :  { %v5504_v0 = vsel %vm5503_vm13, %v5502_v15, %v5497_v57 }
 0x412   :  { %v5562_v52 = vsel %vm5468_vm8, %v5561_v56, %v5557_v34 }
 0x413   :  { %v5567_v63 = vsel %vm5475_vm9, %v5566_v19, %v5562_v52 }
 0x414   :  { %v5572_v48 = vsel %vm5482_vm10, %v5571_v50, %v5567_v63 }
 0x415   :  { %v5398_v30 = vpop.permute.xlu0 %5397  ;;  %v5577_v26 = vsel %vm5489_vm11, %v5576_v41, %v5572_v48 }
 0x416   :  { %v5581_v27 = vrot.slane %v5398_v30, %v5494_v18 }
 0x418   :  { %v5582_v40 = vsel %vm5496_vm12, %v5581_v27, %v5577_v26 }
 0x41a   :  { %v5356_v36 = vpop.permute.xlu1 %5355 }
 0x41b   :  { %v5509_v13 = vrot.slane %v5356_v36, %v5508_v28 }
 0x41d   :  { %v5511_v6 = vsel %vm5510_vm14, %v5509_v13, %v5504_v0 }
 0x41f   :  { %v5401_v37 = vpop.permute.xlu0 %5400 }
 0x420   :  { %v5586_v25 = vrot.slane %v5401_v37, %v5501_v5 }
 0x422   :  { %v5587_v17 = vsel %vm5503_vm13, %v5586_v25, %v5582_v40 }
 0x423   :  { %v5592_v23 = vsel %vm5510_vm14, %v5591_v43, %v5587_v17 }
 0x424   :  { %v5359_v60 = vpop.permute.xlu1 %5358 }
 0x425   :  { %v5516_v29 = vrot.slane %v5359_v60, %v5515_v4 }
 0x427   :  { %v5518_v2 = vsel %vm5517_vm15, %v5516_v29, %v5511_v6 }
 0x42a   :  { %v5407_v55 = vpop.permute.xlu0 %5406 }
 0x42b   :  { %v5596_v7 = vrot.slane %v5407_v55, %v5515_v4 }
 0x42d   :  { %v5597_v32 = vsel %vm5517_vm15, %v5596_v7, %v5592_v23 }
 0x42e   :  { %v5598_v16 = vcombine.low %v5518_v2, %v5597_v32 }
 0x430   :  { %v5605_v49 = vrot.slane %v5598_v16, %v7312_v31 }
 0x432   :  { %v5612_v44 = vrot.slane %v5605_v49, %v7312_v31 }
 0x434   :  { %5618 = vst.msk [vmem:[#allocation3] sm:$0x3] %vm5616_vm0, %v5612_v44 }
 0x435   :  { %6560 = shalt.err (!%p6557_p4)
}
 0x436   :  { %s6561_s3 = scalar_lea.hbm %s8211_s12, 32 }
 0x437   :  { %p6562_p5 = scmp.ne.s32.totalorder %s8211_s12, %s6561_s3  ;;  %p6565_p6 = scmp.lt.u32.totalorder %s6561_s3, %s8211_s12 }
 0x439   :  { %p6567_p7 = pnand %p6565_p6, %p6562_p5 }
 0x43b   :  { %6570 = shalt.err (!%p6567_p7)
}
 0x43c   :  { %5628 = dma.vmem_to_hbm [thread:$0]  %s5626_s15, 32, %s8211_s12, [#allocation4]  }
 0x43d   :  { %6571 = dma.done.wait [#allocation4], 32  }
 0x43e   :  { %6572 = vsyncadd [#allocation4], 4294967264 }
 0x43f   :  { %5632 = vsyncpa [#allocation4], 1 }

</bundles_post_ra>
